<compile_context>
chip_gen: v7x
topology: tpu7x:2x2x1
jax: 0.10.0
libtpu: 0.0.40
codegen_flags: <defaults>
</compile_context>

<pallas_src>
import jax
import jax.numpy as jnp
from jax.experimental import pallas as pl
from jax.experimental.pallas import tpu as pltpu

BN_EPS = 1e-5
LANE = 128                    # lane width: pad channel dims to a multiple
TM = 128                      # output-row tile
TK = 128                      # reduction tile over A's columns
_VMEM_LIMIT = 32 * 1024 * 1024


def _round_up(v, m):
    return (v + m - 1) // m * m


def _pad2d(arr, rows, cols):
    r, c = arr.shape
    if r == rows and c == cols:
        return arr
    return jnp.pad(arr, ((0, rows - r), (0, cols - c)))


# --------------------------- row-wise linear kernels ------------------------ #

def _linear_bias_kernel(x_ref, w_ref, b_ref, o_ref):
    o_ref[...] = (jnp.dot(x_ref[...], w_ref[...],
                          preferred_element_type=jnp.float32) + b_ref[...])


def _dual_linear_kernel(x_ref, wr_ref, b_ref, wl_ref, skip_ref, bmat_ref):
    # One pass over x: skip = x @ Wr + b (f32), bmat = x @ Wl (bf16).
    x = x_ref[...]
    skip_ref[...] = (jnp.dot(x, wr_ref[...],
                             preferred_element_type=jnp.float32) + b_ref[...])
    bmat_ref[...] = jnp.dot(x, wl_ref[...],
                            preferred_element_type=jnp.float32
                            ).astype(jnp.bfloat16)


def _rowwise_linear_bias(x, w, b):
    """x @ w + b, rows tiled (parallel); weights fully VMEM-resident."""
    n_pad, cin = x.shape
    cout = w.shape[1]
    return pl.pallas_call(
        _linear_bias_kernel,
        out_shape=jax.ShapeDtypeStruct((n_pad, cout), jnp.float32),
        grid_spec=pltpu.PrefetchScalarGridSpec(
            num_scalar_prefetch=0, grid=(n_pad // TM,),
            in_specs=[pl.BlockSpec((TM, cin), lambda i: (i, 0)),
                      pl.BlockSpec((cin, cout), lambda i: (0, 0)),
                      pl.BlockSpec((1, cout), lambda i: (0, 0))],
            out_specs=pl.BlockSpec((TM, cout), lambda i: (i, 0))),
        compiler_params=pltpu.CompilerParams(
            dimension_semantics=("parallel",), vmem_limit_bytes=_VMEM_LIMIT),
    )(x, w, b)


def _rowwise_dual_linear(x, wr, b, wl):
    """Single pass over x producing (x@wr+b  f32, x@wl  bf16)."""
    n_pad, cin = x.shape
    cr = wr.shape[1]
    cl = wl.shape[1]
    return pl.pallas_call(
        _dual_linear_kernel,
        out_shape=(jax.ShapeDtypeStruct((n_pad, cr), jnp.float32),
                   jax.ShapeDtypeStruct((n_pad, cl), jnp.bfloat16)),
        grid_spec=pltpu.PrefetchScalarGridSpec(
            num_scalar_prefetch=0, grid=(n_pad // TM,),
            in_specs=[pl.BlockSpec((TM, cin), lambda i: (i, 0)),
                      pl.BlockSpec((cin, cr), lambda i: (0, 0)),
                      pl.BlockSpec((1, cr), lambda i: (0, 0)),
                      pl.BlockSpec((cin, cl), lambda i: (0, 0))],
            out_specs=(pl.BlockSpec((TM, cr), lambda i: (i, 0)),
                       pl.BlockSpec((TM, cl), lambda i: (i, 0)))),
        compiler_params=pltpu.CompilerParams(
            dimension_semantics=("parallel",), vmem_limit_bytes=_VMEM_LIMIT),
    )(x, wr, b, wl)


# --------------------------- tiled aggregation kernel ----------------------- #

def _make_agg_kernel(apply_wl, mode, tm, n_real, c_out_real):
    """acc += A_tile @ B_tile over k; finalize with (optional @Wl) + skip and
    either the folded-BN+ReLU epilogue or log_softmax + variance partials."""

    def kernel(*args):
        if apply_wl:
            a_ref, b_ref, wl_ref, skip_ref = args[:4]
            rest = args[4:]
        else:
            a_ref, b_ref, skip_ref = args[:3]
            wl_ref = None
            rest = args[3:]
        if mode == "hidden":
            scale_ref, shift_ref, o_ref, acc_ref = rest
        else:
            o_ref, sum_ref, sumsq_ref, acc_ref = rest

        # Hoist all grid-index queries to the kernel top level: program_id /
        # num_programs must NOT be bound inside a pl.when (lax.cond) body.
        k = pl.program_id(1)
        last_k = pl.num_programs(1) - 1
        row_base = pl.program_id(0) * tm if mode == "final" else None

        @pl.when(k == 0)
        def _():
            acc_ref[...] = jnp.zeros_like(acc_ref)

        acc_ref[...] += jnp.dot(a_ref[...], b_ref[...],
                                preferred_element_type=jnp.float32)

        @pl.when(k == last_k)
        def _():
            acc = acc_ref[...]
            if apply_wl:
                y = jnp.dot(acc, wl_ref[...],
                            preferred_element_type=jnp.float32) + skip_ref[...]
            else:
                y = acc + skip_ref[...]

            if mode == "hidden":
                # folded BatchNorm1d (eval stats) + ReLU; dropout = identity.
                o_ref[...] = jnp.maximum(y * scale_ref[...] + shift_ref[...], 0.0)
            else:
                # log_softmax over the real output lanes only.
                lane = jax.lax.broadcasted_iota(jnp.int32, y.shape, 1)
                valid_lane = lane < c_out_real
                ym = jnp.where(valid_lane, y, jnp.float32(-1e30))
                m = jnp.max(ym, axis=-1, keepdims=True)
                z = ym - m
                p = jnp.where(valid_lane, jnp.exp(z), 0.0)
                lse = jnp.log(jnp.sum(p, axis=-1, keepdims=True))
                o_ref[...] = jnp.where(valid_lane, z - lse, 0.0)
                # one-pass sum / sum-of-squares partials for torch.var(logits),
                # masked to real rows & lanes; combined across row tiles outside.
                row = (jax.lax.broadcasted_iota(jnp.int32, y.shape, 0)
                       + row_base)
                valid = jnp.logical_and(row < n_real, valid_lane)
                yv = jnp.where(valid, y, 0.0)
                s = jnp.sum(yv)
                ss = jnp.sum(yv * yv)
                sum_ref[...] = jnp.full(sum_ref.shape, s, jnp.float32)
                sumsq_ref[...] = jnp.full(sumsq_ref.shape, ss, jnp.float32)

    return kernel


def _aggregate(a_bf16, b_mat, skip, *, wl=None, scale=None, shift=None,
               mode="hidden", n_real=None, c_out_real=None):
    n_pad = a_bf16.shape[0]
    cb = b_mat.shape[1]
    cout = skip.shape[1]
    n_i = n_pad // TM
    n_k = n_pad // TK
    apply_wl = wl is not None

    kernel = _make_agg_kernel(apply_wl, mode, TM, n_real, c_out_real)

    in_arrays = [a_bf16, b_mat]
    in_specs = [pl.BlockSpec((TM, TK), lambda i, k: (i, k)),
                pl.BlockSpec((TK, cb), lambda i, k: (k, 0))]
    if apply_wl:
        in_arrays.append(wl)
        in_specs.append(pl.BlockSpec(wl.shape, lambda i, k: (0, 0)))
    in_arrays.append(skip)
    in_specs.append(pl.BlockSpec((TM, cout), lambda i, k: (i, 0)))

    if mode == "hidden":
        in_arrays += [scale, shift]
        in_specs += [pl.BlockSpec((1, cout), lambda i, k: (0, 0)),
                     pl.BlockSpec((1, cout), lambda i, k: (0, 0))]
        out_shape = jax.ShapeDtypeStruct((n_pad, cout), jnp.float32)
        out_specs = pl.BlockSpec((TM, cout), lambda i, k: (i, 0))
    else:
        out_shape = (jax.ShapeDtypeStruct((n_pad, cout), jnp.float32),
                     jax.ShapeDtypeStruct((n_i, 8, 128), jnp.float32),
                     jax.ShapeDtypeStruct((n_i, 8, 128), jnp.float32))
        out_specs = (pl.BlockSpec((TM, cout), lambda i, k: (i, 0)),
                     pl.BlockSpec((1, 8, 128), lambda i, k: (i, 0, 0)),
                     pl.BlockSpec((1, 8, 128), lambda i, k: (i, 0, 0)))

    return pl.pallas_call(
        kernel,
        out_shape=out_shape,
        grid_spec=pltpu.PrefetchScalarGridSpec(
            num_scalar_prefetch=0, grid=(n_i, n_k),
            in_specs=in_specs, out_specs=out_specs,
            scratch_shapes=[pltpu.VMEM((TM, cb), jnp.float32)]),
        compiler_params=pltpu.CompilerParams(
            dimension_semantics=("parallel", "arbitrary"),
            vmem_limit_bytes=_VMEM_LIMIT),
    )(*in_arrays)


# ------------------------------ layer wrapper ------------------------------- #

def _sage_layer(a_bf16, h, lyr, *, mode, n_real, scale=None, shift=None):
    """One SAGEConv(normalize=False): lin_l(mean_agg(x)) + lin_r(x), fused with
    its epilogue (folded-BN+ReLU or log_softmax+var)."""
    wl, wr, b = lyr["wl"], lyr["wr"], lyr["b"]
    c_in, c_out = wl.shape
    cin_p = _round_up(c_in, LANE)
    cout_p = _round_up(c_out, LANE)
    assert h.shape[1] == cin_p

    wl_p = _pad2d(wl, cin_p, cout_p)
    wr_p = _pad2d(wr, cin_p, cout_p)
    b_p = _pad2d(b, 1, cout_p)

    if c_out <= c_in:
        # Reassociate: aggregate the narrower x@Wl  ->  A @ (x @ Wl).
        # Both row-wise matmuls share one pass over h.
        skip, b_mat = _rowwise_dual_linear(h, wr_p, b_p, wl_p)
        wl_post = None
    else:
        # Aggregate raw features (narrower); apply Wl after the reduction.
        skip = _rowwise_linear_bias(h, wr_p, b_p)        # x @ Wr + b  (f32)
        b_mat = h.astype(jnp.bfloat16)
        wl_post = wl_p

    if mode == "hidden":
        scale_p = _pad2d(scale, 1, cout_p)
        shift_p = _pad2d(shift, 1, cout_p)
        return _aggregate(a_bf16, b_mat, skip, wl=wl_post,
                          scale=scale_p, shift=shift_p,
                          mode="hidden", n_real=n_real, c_out_real=c_out)
    return _aggregate(a_bf16, b_mat, skip, wl=wl_post,
                      mode="final", n_real=n_real, c_out_real=c_out)


# ------------------------------ graph / params ------------------------------ #

def build_mean_adjacency(edge_index, num_nodes, n_pad):
    """Row-normalized dense adjacency in bf16 (A[i,j]=1/deg_in(i) per edge j->i).
    Padded rows/cols are zero, so padded nodes never contribute."""
    # TODO(synk): replace the O(N^2) dense adjacency with a CSR/block-sparse
    # formulation (scalar-prefetched neighbor lists) for large graphs.
    src, dst = edge_index[0], edge_index[1]
    a = jnp.zeros((n_pad, n_pad), jnp.float32).at[dst, src].add(1.0)
    deg = jnp.sum(a, axis=1, keepdims=True)
    a = a / jnp.maximum(deg, 1.0)
    return a.astype(jnp.bfloat16)


def init_sage_conv(key, c_in, c_out):
    k1, k2, k3 = jax.random.split(key, 3)
    bound = 1.0 / jnp.sqrt(jnp.float32(c_in))
    wl = jax.random.uniform(k1, (c_in, c_out), jnp.float32, -bound, bound)
    wr = jax.random.uniform(k2, (c_in, c_out), jnp.float32, -bound, bound)
    b = jax.random.uniform(k3, (1, c_out), jnp.float32, -bound, bound)
    return {"wl": wl, "wr": wr, "b": b}


def init_bn(c):
    return {"mean": jnp.zeros((1, c), jnp.float32),
            "var": jnp.ones((1, c), jnp.float32),
            "gamma": jnp.ones((1, c), jnp.float32),
            "beta": jnp.zeros((1, c), jnp.float32)}


def init_sage_params(key, in_channels, hidden_channels, out_channels, n_layers=2):
    keys = jax.random.split(key, max(n_layers, 1))
    layers, bns = [], []
    if n_layers == 1:
        layers.append(init_sage_conv(keys[0], in_channels, out_channels))
    else:
        dims = [in_channels] + [hidden_channels] * (n_layers - 1) + [out_channels]
        for i in range(n_layers):
            layers.append(init_sage_conv(keys[i], dims[i], dims[i + 1]))
            if i < n_layers - 1:
                bns.append(init_bn(dims[i + 1]))
    return {"layers": layers, "bns": bns}


# -------------------------------- forward ----------------------------------- #

@jax.jit
def sage_forward(params, x, edge_index):
    layers, bns = params["layers"], params["bns"]
    n = x.shape[0]
    n_pad = _round_up(n, max(TM, TK))
    a = build_mean_adjacency(edge_index, n, n_pad)

    h = _pad2d(x.astype(jnp.float32), n_pad, _round_up(x.shape[1], LANE))

    hidden_layers = layers[:-1] if len(layers) > 1 else layers
    for i, lyr in enumerate(hidden_layers):
        if i < len(bns):
            bn = bns[i]
            # Fold BatchNorm1d (eval) to a single scale/shift FMA.
            scale = bn["gamma"] * jax.lax.rsqrt(bn["var"] + BN_EPS)
            shift = bn["beta"] - bn["mean"] * scale
        else:
            # n_layers == 1: the BN lookup raises in PyTorch and is swallowed;
            # only ReLU (+ identity dropout) applies.
            c_out = lyr["wl"].shape[1]
            scale = jnp.ones((1, c_out), jnp.float32)
            shift = jnp.zeros((1, c_out), jnp.float32)
        h = _sage_layer(a, h, lyr, mode="hidden", n_real=n,
                        scale=scale, shift=shift)

    if len(layers) > 1:
        lyr = layers[-1]
        c_out = lyr["wl"].shape[1]
        log_probs_pad, s_part, ss_part = _sage_layer(a, h, lyr,
                                                     mode="final", n_real=n)
        total = n * c_out
        s = jnp.sum(s_part[:, 0, 0])
        ss = jnp.sum(ss_part[:, 0, 0])
        mean = s / total
        var = (ss - total * mean * mean) / (total - 1)   # unbiased, torch.var
        return log_probs_pad[:n, :c_out], var

    # TODO(synk): 1-layer path computes the log_softmax/var epilogue in plain
    # JAX on the Pallas layer output (path not exercised by the demo below).
    c_out = layers[0]["wl"].shape[1]
    logits = h[:n, :c_out]
    return jax.nn.log_softmax(logits, axis=-1), jnp.var(logits, ddof=1)


# --------------------------------- main -------------------------------------- #

if __name__ == "__main__":
    key = jax.random.PRNGKey(0)
    k_x, k_e, k_p = jax.random.split(key, 3)

    N, E = 256, 768                   # nodes, edges (N spans a 2x2 tile grid)
    IN_C, HID_C, OUT_C = 4, 32, 8     # channels
    N_LAYERS = 2

    x = jax.random.normal(k_x, (N, IN_C), jnp.float32)
    edge_index = jax.random.randint(k_e, (2, E), 0, N, dtype=jnp.int32)
    params = init_sage_params(k_p, IN_C, HID_C, OUT_C, n_layers=N_LAYERS)

    log_probs, var = sage_forward(params, x, edge_index)
    jax.block_until_ready((log_probs, var))

    assert log_probs.shape == (N, OUT_C)
    assert var.shape == ()
    assert bool(jnp.all(jnp.isfinite(log_probs))) and bool(jnp.isfinite(var))
    # log_softmax rows must normalize.
    assert bool(jnp.allclose(jnp.sum(jnp.exp(log_probs), axis=-1), 1.0, atol=1e-3))
    print("KERNEL_OK")
</pallas_src>

<mosaic_0001>
module attributes {stable_mosaic.version = 11 : i64} {
  func.func private @main(%arg0: i32) attributes {dimension_semantics = [#tpu.dimension_semantics<core_parallel>], iteration_bounds = array<i64: 2>, tpu.core_type = #tpu.core_type<sc_scalar_subcore>, window_params = []} {
    return
  }
}

module attributes {stable_mosaic.version = 11 : i64} {
  func.func private @main(%arg0: i32) attributes {dimension_semantics = [#tpu.dimension_semantics<core_parallel>], iteration_bounds = array<i64: 2>, tpu.core_type = #tpu.core_type<sc_scalar_subcore>, window_params = []} {
    return
  }
}

module attributes {stable_mosaic.version = 11 : i64} {
  func.func @_linear_bias_kernel(%arg0: i32, %arg1: memref<128x128xf32, #tpu.memory_space<vmem>>, %arg2: memref<128x128xf32, #tpu.memory_space<vmem>>, %arg3: memref<1x128xf32, #tpu.memory_space<vmem>>, %arg4: memref<128x128xf32, #tpu.memory_space<vmem>>) attributes {dimension_semantics = [#tpu.dimension_semantics<parallel>], iteration_bounds = array<i64: 2>, scalar_prefetch = 0 : i64, scratch_operands = 0 : i64, tpu.core_type = #tpu.core_type<tc>, window_params = [{transform_indices = @transform_0, window_bounds = array<i64: 128, 128>}, {pipeline_mode = #tpu.pipeline_mode<synchronous>, transform_indices = @transform_1, window_bounds = array<i64: 128, 128>}, {pipeline_mode = #tpu.pipeline_mode<synchronous>, transform_indices = @transform_2, window_bounds = array<i64: 1, 128>}, {transform_indices = @transform_3, window_bounds = array<i64: 128, 128>}]} {
    %c0 = arith.constant 0 : index
    %c0_0 = arith.constant 0 : index
    %0 = vector.load %arg1[%c0, %c0_0] : memref<128x128xf32, #tpu.memory_space<vmem>>, vector<128x128xf32>
    %c0_1 = arith.constant 0 : index
    %c0_2 = arith.constant 0 : index
    %1 = vector.load %arg2[%c0_1, %c0_2] : memref<128x128xf32, #tpu.memory_space<vmem>>, vector<128x128xf32>
    %cst = arith.constant dense<0.000000e+00> : vector<128x128xf32>
    %2 = tpu.matmul %0, %1, %cst {dimension_numbers = #tpu.dot_dimension_numbers<[1], [0], [0], [1], [0, 0, 1, 1], [], []>} : vector<128x128xf32>, vector<128x128xf32>, vector<128x128xf32> -> vector<128x128xf32>
    %c0_3 = arith.constant 0 : index
    %c0_4 = arith.constant 0 : index
    %3 = vector.load %arg3[%c0_3, %c0_4] : memref<1x128xf32, #tpu.memory_space<vmem>>, vector<1x128xf32>
    %4 = vector.broadcast %3 : vector<1x128xf32> to vector<128x128xf32>
    %5 = arith.addf %2, %4 : vector<128x128xf32>
    %c0_5 = arith.constant 0 : index
    %c0_6 = arith.constant 0 : index
    %6 = vector.load %arg4[%c0_5, %c0_6] : memref<128x128xf32, #tpu.memory_space<vmem>>, vector<128x128xf32>
    tpu.vector_store %arg4[%c0_5, %c0_6], %5 {strides = array<i32>} : memref<128x128xf32, #tpu.memory_space<vmem>>, vector<128x128xf32>,
    return
  }
  func.func @transform_0(%arg0: i32) -> (i32, i32) {
    %c0_i32 = arith.constant 0 : i32
    %c0_i32_0 = arith.constant 0 : i32
    return %arg0, %c0_i32 : i32, i32
  }
  func.func @transform_1(%arg0: i32) -> (i32, i32) {
    %c0_i32 = arith.constant 0 : i32
    %c0_i32_0 = arith.constant 0 : i32
    %c0_i32_1 = arith.constant 0 : i32
    return %c0_i32, %c0_i32_0 : i32, i32
  }
  func.func @transform_2(%arg0: i32) -> (i32, i32) {
    %c0_i32 = arith.constant 0 : i32
    %c0_i32_0 = arith.constant 0 : i32
    %c0_i32_1 = arith.constant 0 : i32
    return %c0_i32, %c0_i32_0 : i32, i32
  }
  func.func @transform_3(%arg0: i32) -> (i32, i32) {
    %c0_i32 = arith.constant 0 : i32
    %c0_i32_0 = arith.constant 0 : i32
    return %arg0, %c0_i32 : i32, i32
  }
}

module attributes {stable_mosaic.version = 11 : i64} {
  func.func @kernel(%arg0: i32, %arg1: i32, %arg2: memref<128x128xbf16, #tpu.memory_space<vmem>>, %arg3: memref<128x128xbf16, #tpu.memory_space<vmem>>, %arg4: memref<128x128xf32, #tpu.memory_space<vmem>>, %arg5: memref<128x128xf32, #tpu.memory_space<vmem>>, %arg6: memref<1x128xf32, #tpu.memory_space<vmem>>, %arg7: memref<1x128xf32, #tpu.memory_space<vmem>>, %arg8: memref<128x128xf32, #tpu.memory_space<vmem>>, %arg9: memref<128x128xf32, #tpu.memory_space<vmem>>) attributes {dimension_semantics = [#tpu.dimension_semantics<parallel>, #tpu.dimension_semantics<arbitrary>], iteration_bounds = array<i64: 2, 2>, scalar_prefetch = 0 : i64, scratch_operands = 1 : i64, tpu.core_type = #tpu.core_type<tc>, window_params = [{transform_indices = @transform_0, window_bounds = array<i64: 128, 128>}, {transform_indices = @transform_1, window_bounds = array<i64: 128, 128>}, {pipeline_mode = #tpu.pipeline_mode<synchronous>, transform_indices = @transform_2, window_bounds = array<i64: 128, 128>}, {transform_indices = @transform_3, window_bounds = array<i64: 128, 128>}, {pipeline_mode = #tpu.pipeline_mode<synchronous>, transform_indices = @transform_4, window_bounds = array<i64: 1, 128>}, {pipeline_mode = #tpu.pipeline_mode<synchronous>, transform_indices = @transform_5, window_bounds = array<i64: 1, 128>}, {transform_indices = @transform_6, window_bounds = array<i64: 128, 128>}]} {
    %c0_i32 = arith.constant 0 : i32
    %0 = arith.cmpi eq, %arg1, %c0_i32 : i32
    %1 = arith.extui %0 : i1 to i32
    %c0_i32_0 = arith.constant 0 : i32
    %2 = arith.cmpi ne, %1, %c0_i32_0 : i32
    scf.if %2 {
      %cst_9 = arith.constant 0.000000e+00 : f32
      %12 = vector.broadcast %cst_9 : f32 to vector<128x128xf32>
      %c0_10 = arith.constant 0 : index
      %c0_11 = arith.constant 0 : index
      %13 = vector.load %arg9[%c0_10, %c0_11] : memref<128x128xf32, #tpu.memory_space<vmem>>, vector<128x128xf32>
      tpu.vector_store %arg9[%c0_10, %c0_11], %12 {strides = array<i32>} : memref<128x128xf32, #tpu.memory_space<vmem>>, vector<128x128xf32>,
    } else {
    }
    %c0 = arith.constant 0 : index
    %c0_1 = arith.constant 0 : index
    %3 = vector.load %arg9[%c0, %c0_1] : memref<128x128xf32, #tpu.memory_space<vmem>>, vector<128x128xf32>
    %c0_2 = arith.constant 0 : index
    %c0_3 = arith.constant 0 : index
    %4 = vector.load %arg2[%c0_2, %c0_3] : memref<128x128xbf16, #tpu.memory_space<vmem>>, vector<128x128xbf16>
    %c0_4 = arith.constant 0 : index
    %c0_5 = arith.constant 0 : index
    %5 = vector.load %arg3[%c0_4, %c0_5] : memref<128x128xbf16, #tpu.memory_space<vmem>>, vector<128x128xbf16>
    %cst = arith.constant dense<0.000000e+00> : vector<128x128xf32>
    %6 = tpu.matmul %4, %5, %cst {dimension_numbers = #tpu.dot_dimension_numbers<[1], [0], [0], [1], [0, 0, 1, 1], [], []>} : vector<128x128xbf16>, vector<128x128xbf16>, vector<128x128xf32> -> vector<128x128xf32>
    %7 = arith.addf %3, %6 : vector<128x128xf32>
    %c0_6 = arith.constant 0 : index
    %c0_7 = arith.constant 0 : index
    %8 = vector.load %arg9[%c0_6, %c0_7] : memref<128x128xf32, #tpu.memory_space<vmem>>, vector<128x128xf32>
    tpu.vector_store %arg9[%c0_6, %c0_7], %7 {strides = array<i32>} : memref<128x128xf32, #tpu.memory_space<vmem>>, vector<128x128xf32>,
    %c1_i32 = arith.constant 1 : i32
    %9 = arith.cmpi eq, %arg1, %c1_i32 : i32
    %10 = arith.extui %9 : i1 to i32
    %c0_i32_8 = arith.constant 0 : i32
    %11 = arith.cmpi ne, %10, %c0_i32_8 : i32
    scf.if %11 {
      %c0_9 = arith.constant 0 : index
      %c0_10 = arith.constant 0 : index
      %12 = vector.load %arg9[%c0_9, %c0_10] : memref<128x128xf32, #tpu.memory_space<vmem>>, vector<128x128xf32>
      %c0_11 = arith.constant 0 : index
      %c0_12 = arith.constant 0 : index
      %13 = vector.load %arg4[%c0_11, %c0_12] : memref<128x128xf32, #tpu.memory_space<vmem>>, vector<128x128xf32>
      %cst_13 = arith.constant dense<0.000000e+00> : vector<128x128xf32>
      %14 = tpu.matmul %12, %13, %cst_13 {dimension_numbers = #tpu.dot_dimension_numbers<[1], [0], [0], [1], [0, 0, 1, 1], [], []>} : vector<128x128xf32>, vector<128x128xf32>, vector<128x128xf32> -> vector<128x128xf32>
      %c0_14 = arith.constant 0 : index
      %c0_15 = arith.constant 0 : index
      %15 = vector.load %arg5[%c0_14, %c0_15] : memref<128x128xf32, #tpu.memory_space<vmem>>, vector<128x128xf32>
      %16 = arith.addf %14, %15 : vector<128x128xf32>
      %c0_16 = arith.constant 0 : index
      %c0_17 = arith.constant 0 : index
      %17 = vector.load %arg6[%c0_16, %c0_17] : memref<1x128xf32, #tpu.memory_space<vmem>>, vector<1x128xf32>
      %18 = vector.broadcast %17 : vector<1x128xf32> to vector<128x128xf32>
      %19 = arith.mulf %16, %18 : vector<128x128xf32>
      %c0_18 = arith.constant 0 : index
      %c0_19 = arith.constant 0 : index
      %20 = vector.load %arg7[%c0_18, %c0_19] : memref<1x128xf32, #tpu.memory_space<vmem>>, vector<1x128xf32>
      %21 = vector.broadcast %20 : vector<1x128xf32> to vector<128x128xf32>
      %22 = arith.addf %19, %21 : vector<128x128xf32>
      %cst_20 = arith.constant 0.000000e+00 : f32
      %23 = vector.broadcast %cst_20 : f32 to vector<128x128xf32>
      %24 = arith.maximumf %22, %23 : vector<128x128xf32>
      %c0_21 = arith.constant 0 : index
      %c0_22 = arith.constant 0 : index
      %25 = vector.load %arg8[%c0_21, %c0_22] : memref<128x128xf32, #tpu.memory_space<vmem>>, vector<128x128xf32>
      tpu.vector_store %arg8[%c0_21, %c0_22], %24 {strides = array<i32>} : memref<128x128xf32, #tpu.memory_space<vmem>>, vector<128x128xf32>,
    } else {
    }
    return
  }
  func.func @transform_0(%arg0: i32, %arg1: i32) -> (i32, i32) {
    %c0_i32 = arith.constant 0 : i32
    return %arg0, %arg1 : i32, i32
  }
  func.func @transform_1(%arg0: i32, %arg1: i32) -> (i32, i32) {
    %c0_i32 = arith.constant 0 : i32
    %c0_i32_0 = arith.constant 0 : i32
    return %arg1, %c0_i32 : i32, i32
  }
  func.func @transform_2(%arg0: i32, %arg1: i32) -> (i32, i32) {
    %c0_i32 = arith.constant 0 : i32
    %c0_i32_0 = arith.constant 0 : i32
    %c0_i32_1 = arith.constant 0 : i32
    return %c0_i32, %c0_i32_0 : i32, i32
  }
  func.func @transform_3(%arg0: i32, %arg1: i32) -> (i32, i32) {
    %c0_i32 = arith.constant 0 : i32
    %c0_i32_0 = arith.constant 0 : i32
    return %arg0, %c0_i32 : i32, i32
  }
  func.func @transform_4(%arg0: i32, %arg1: i32) -> (i32, i32) {
    %c0_i32 = arith.constant 0 : i32
    %c0_i32_0 = arith.constant 0 : i32
    %c0_i32_1 = arith.constant 0 : i32
    return %c0_i32, %c0_i32_0 : i32, i32
  }
  func.func @transform_5(%arg0: i32, %arg1: i32) -> (i32, i32) {
    %c0_i32 = arith.constant 0 : i32
    %c0_i32_0 = arith.constant 0 : i32
    %c0_i32_1 = arith.constant 0 : i32
    return %c0_i32, %c0_i32_0 : i32, i32
  }
  func.func @transform_6(%arg0: i32, %arg1: i32) -> (i32, i32) {
    %c0_i32 = arith.constant 0 : i32
    %c0_i32_0 = arith.constant 0 : i32
    return %arg0, %c0_i32 : i32, i32
  }
}

module attributes {stable_mosaic.version = 11 : i64} {
  func.func @_dual_linear_kernel(%arg0: i32, %arg1: memref<128x128xf32, #tpu.memory_space<vmem>>, %arg2: memref<128x128xf32, #tpu.memory_space<vmem>>, %arg3: memref<1x128xf32, #tpu.memory_space<vmem>>, %arg4: memref<128x128xf32, #tpu.memory_space<vmem>>, %arg5: memref<128x128xf32, #tpu.memory_space<vmem>>, %arg6: memref<128x128xbf16, #tpu.memory_space<vmem>>) attributes {dimension_semantics = [#tpu.dimension_semantics<parallel>], iteration_bounds = array<i64: 2>, scalar_prefetch = 0 : i64, scratch_operands = 0 : i64, tpu.core_type = #tpu.core_type<tc>, window_params = [{transform_indices = @transform_0, window_bounds = array<i64: 128, 128>}, {pipeline_mode = #tpu.pipeline_mode<synchronous>, transform_indices = @transform_1, window_bounds = array<i64: 128, 128>}, {pipeline_mode = #tpu.pipeline_mode<synchronous>, transform_indices = @transform_2, window_bounds = array<i64: 1, 128>}, {pipeline_mode = #tpu.pipeline_mode<synchronous>, transform_indices = @transform_3, window_bounds = array<i64: 128, 128>}, {transform_indices = @transform_4, window_bounds = array<i64: 128, 128>}, {transform_indices = @transform_5, window_bounds = array<i64: 128, 128>}]} {
    %c0 = arith.constant 0 : index
    %c0_0 = arith.constant 0 : index
    %0 = vector.load %arg1[%c0, %c0_0] : memref<128x128xf32, #tpu.memory_space<vmem>>, vector<128x128xf32>
    %c0_1 = arith.constant 0 : index
    %c0_2 = arith.constant 0 : index
    %1 = vector.load %arg2[%c0_1, %c0_2] : memref<128x128xf32, #tpu.memory_space<vmem>>, vector<128x128xf32>
    %cst = arith.constant dense<0.000000e+00> : vector<128x128xf32>
    %2 = tpu.matmul %0, %1, %cst {dimension_numbers = #tpu.dot_dimension_numbers<[1], [0], [0], [1], [0, 0, 1, 1], [], []>} : vector<128x128xf32>, vector<128x128xf32>, vector<128x128xf32> -> vector<128x128xf32>
    %c0_3 = arith.constant 0 : index
    %c0_4 = arith.constant 0 : index
    %3 = vector.load %arg3[%c0_3, %c0_4] : memref<1x128xf32, #tpu.memory_space<vmem>>, vector<1x128xf32>
    %4 = vector.broadcast %3 : vector<1x128xf32> to vector<128x128xf32>
    %5 = arith.addf %2, %4 : vector<128x128xf32>
    %c0_5 = arith.constant 0 : index
    %c0_6 = arith.constant 0 : index
    %6 = vector.load %arg5[%c0_5, %c0_6] : memref<128x128xf32, #tpu.memory_space<vmem>>, vector<128x128xf32>
    tpu.vector_store %arg5[%c0_5, %c0_6], %5 {strides = array<i32>} : memref<128x128xf32, #tpu.memory_space<vmem>>, vector<128x128xf32>,
    %c0_7 = arith.constant 0 : index
    %c0_8 = arith.constant 0 : index
    %7 = vector.load %arg4[%c0_7, %c0_8] : memref<128x128xf32, #tpu.memory_space<vmem>>, vector<128x128xf32>
    %cst_9 = arith.constant dense<0.000000e+00> : vector<128x128xf32>
    %8 = tpu.matmul %0, %7, %cst_9 {dimension_numbers = #tpu.dot_dimension_numbers<[1], [0], [0], [1], [0, 0, 1, 1], [], []>} : vector<128x128xf32>, vector<128x128xf32>, vector<128x128xf32> -> vector<128x128xf32>
    %9 = arith.truncf %8 : vector<128x128xf32> to vector<128x128xbf16>
    %c0_10 = arith.constant 0 : index
    %c0_11 = arith.constant 0 : index
    %10 = vector.load %arg6[%c0_10, %c0_11] : memref<128x128xbf16, #tpu.memory_space<vmem>>, vector<128x128xbf16>
    tpu.vector_store %arg6[%c0_10, %c0_11], %9 {strides = array<i32>} : memref<128x128xbf16, #tpu.memory_space<vmem>>, vector<128x128xbf16>,
    return
  }
  func.func @transform_0(%arg0: i32) -> (i32, i32) {
    %c0_i32 = arith.constant 0 : i32
    %c0_i32_0 = arith.constant 0 : i32
    return %arg0, %c0_i32 : i32, i32
  }
  func.func @transform_1(%arg0: i32) -> (i32, i32) {
    %c0_i32 = arith.constant 0 : i32
    %c0_i32_0 = arith.constant 0 : i32
    %c0_i32_1 = arith.constant 0 : i32
    return %c0_i32, %c0_i32_0 : i32, i32
  }
  func.func @transform_2(%arg0: i32) -> (i32, i32) {
    %c0_i32 = arith.constant 0 : i32
    %c0_i32_0 = arith.constant 0 : i32
    %c0_i32_1 = arith.constant 0 : i32
    return %c0_i32, %c0_i32_0 : i32, i32
  }
  func.func @transform_3(%arg0: i32) -> (i32, i32) {
    %c0_i32 = arith.constant 0 : i32
    %c0_i32_0 = arith.constant 0 : i32
    %c0_i32_1 = arith.constant 0 : i32
    return %c0_i32, %c0_i32_0 : i32, i32
  }
  func.func @transform_4(%arg0: i32) -> (i32, i32) {
    %c0_i32 = arith.constant 0 : i32
    %c0_i32_0 = arith.constant 0 : i32
    return %arg0, %c0_i32 : i32, i32
  }
  func.func @transform_5(%arg0: i32) -> (i32, i32) {
    %c0_i32 = arith.constant 0 : i32
    %c0_i32_0 = arith.constant 0 : i32
    return %arg0, %c0_i32 : i32, i32
  }
}

module attributes {stable_mosaic.version = 11 : i64} {
  func.func @kernel(%arg0: i32, %arg1: i32, %arg2: memref<128x128xbf16, #tpu.memory_space<vmem>>, %arg3: memref<128x128xbf16, #tpu.memory_space<vmem>>, %arg4: memref<128x128xf32, #tpu.memory_space<vmem>>, %arg5: memref<128x128xf32, #tpu.memory_space<vmem>>, %arg6: memref<1x8x128xf32, #tpu.memory_space<vmem>>, %arg7: memref<1x8x128xf32, #tpu.memory_space<vmem>>, %arg8: memref<128x128xf32, #tpu.memory_space<vmem>>) attributes {dimension_semantics = [#tpu.dimension_semantics<parallel>, #tpu.dimension_semantics<arbitrary>], iteration_bounds = array<i64: 2, 2>, scalar_prefetch = 0 : i64, scratch_operands = 1 : i64, tpu.core_type = #tpu.core_type<tc>, window_params = [{transform_indices = @transform_0, window_bounds = array<i64: 128, 128>}, {transform_indices = @transform_1, window_bounds = array<i64: 128, 128>}, {transform_indices = @transform_2, window_bounds = array<i64: 128, 128>}, {transform_indices = @transform_3, window_bounds = array<i64: 128, 128>}, {transform_indices = @transform_4, window_bounds = array<i64: 1, 8, 128>}, {transform_indices = @transform_5, window_bounds = array<i64: 1, 8, 128>}]} {
    %c128_i32 = arith.constant 128 : i32
    %0 = arith.muli %arg0, %c128_i32 : i32
    %c0_i32 = arith.constant 0 : i32
    %1 = arith.cmpi eq, %arg1, %c0_i32 : i32
    %2 = arith.extui %1 : i1 to i32
    %c0_i32_0 = arith.constant 0 : i32
    %3 = arith.cmpi ne, %2, %c0_i32_0 : i32
    scf.if %3 {
      %cst_9 = arith.constant 0.000000e+00 : f32
      %13 = vector.broadcast %cst_9 : f32 to vector<128x128xf32>
      %c0_10 = arith.constant 0 : index
      %c0_11 = arith.constant 0 : index
      %14 = vector.load %arg8[%c0_10, %c0_11] : memref<128x128xf32, #tpu.memory_space<vmem>>, vector<128x128xf32>
      tpu.vector_store %arg8[%c0_10, %c0_11], %13 {strides = array<i32>} : memref<128x128xf32, #tpu.memory_space<vmem>>, vector<128x128xf32>,
    } else {
    }
    %c0 = arith.constant 0 : index
    %c0_1 = arith.constant 0 : index
    %4 = vector.load %arg8[%c0, %c0_1] : memref<128x128xf32, #tpu.memory_space<vmem>>, vector<128x128xf32>
    %c0_2 = arith.constant 0 : index
    %c0_3 = arith.constant 0 : index
    %5 = vector.load %arg2[%c0_2, %c0_3] : memref<128x128xbf16, #tpu.memory_space<vmem>>, vector<128x128xbf16>
    %c0_4 = arith.constant 0 : index
    %c0_5 = arith.constant 0 : index
    %6 = vector.load %arg3[%c0_4, %c0_5] : memref<128x128xbf16, #tpu.memory_space<vmem>>, vector<128x128xbf16>
    %cst = arith.constant dense<0.000000e+00> : vector<128x128xf32>
    %7 = tpu.matmul %5, %6, %cst {dimension_numbers = #tpu.dot_dimension_numbers<[1], [0], [0], [1], [0, 0, 1, 1], [], []>} : vector<128x128xbf16>, vector<128x128xbf16>, vector<128x128xf32> -> vector<128x128xf32>
    %8 = arith.addf %4, %7 : vector<128x128xf32>
    %c0_6 = arith.constant 0 : index
    %c0_7 = arith.constant 0 : index
    %9 = vector.load %arg8[%c0_6, %c0_7] : memref<128x128xf32, #tpu.memory_space<vmem>>, vector<128x128xf32>
    tpu.vector_store %arg8[%c0_6, %c0_7], %8 {strides = array<i32>} : memref<128x128xf32, #tpu.memory_space<vmem>>, vector<128x128xf32>,
    %c1_i32 = arith.constant 1 : i32
    %10 = arith.cmpi eq, %arg1, %c1_i32 : i32
    %11 = arith.extui %10 : i1 to i32
    %c0_i32_8 = arith.constant 0 : i32
    %12 = arith.cmpi ne, %11, %c0_i32_8 : i32
    scf.if %12 {
      %c0_9 = arith.constant 0 : index
      %c0_10 = arith.constant 0 : index
      %13 = vector.load %arg8[%c0_9, %c0_10] : memref<128x128xf32, #tpu.memory_space<vmem>>, vector<128x128xf32>
      %c0_11 = arith.constant 0 : index
      %c0_12 = arith.constant 0 : index
      %14 = vector.load %arg4[%c0_11, %c0_12] : memref<128x128xf32, #tpu.memory_space<vmem>>, vector<128x128xf32>
      %15 = arith.addf %13, %14 : vector<128x128xf32>
      %16 = tpu.iota {dimensions = array<i32: 1>} : vector<128x128xi32>
      %c8_i32 = arith.constant 8 : i32
      %17 = vector.broadcast %c8_i32 : i32 to vector<128x128xi32>
      %18 = arith.cmpi slt, %16, %17 : vector<128x128xi32>
      %cst_13 = arith.constant -1.000000e+30 : f32
      %19 = vector.broadcast %cst_13 : f32 to vector<128x128xf32>
      %20 = arith.select %18, %15, %19 : vector<128x128xi1>, vector<128x128xf32>
      %cst_14 = arith.constant dense<0xFF800000> : vector<128xf32>
      %21 = vector.multi_reduction <maximumf>, %20, %cst_14 [1] : vector<128x128xf32> to vector<128xf32>
      %22 = vector.shape_cast %21 : vector<128xf32> to vector<128x1xf32>
      %23 = vector.broadcast %22 : vector<128x1xf32> to vector<128x128xf32>
      %24 = arith.subf %20, %23 : vector<128x128xf32>
      %25 = math.exp %24 : vector<128x128xf32>
      %cst_15 = arith.constant 0.000000e+00 : f32
      %26 = vector.broadcast %cst_15 : f32 to vector<128x128xf32>
      %27 = arith.select %18, %25, %26 : vector<128x128xi1>, vector<128x128xf32>
      %cst_16 = arith.constant dense<0.000000e+00> : vector<128xf32>
      %28 = vector.multi_reduction <add>, %27, %cst_16 [1] : vector<128x128xf32> to vector<128xf32>
      %29 = vector.shape_cast %28 : vector<128xf32> to vector<128x1xf32>
      %30 = math.log %29 : vector<128x1xf32>
      %31 = vector.broadcast %30 : vector<128x1xf32> to vector<128x128xf32>
      %32 = arith.subf %24, %31 : vector<128x128xf32>
      %cst_17 = arith.constant 0.000000e+00 : f32
      %33 = vector.broadcast %cst_17 : f32 to vector<128x128xf32>
      %34 = arith.select %18, %32, %33 : vector<128x128xi1>, vector<128x128xf32>
      %c0_18 = arith.constant 0 : index
      %c0_19 = arith.constant 0 : index
      %35 = vector.load %arg5[%c0_18, %c0_19] : memref<128x128xf32, #tpu.memory_space<vmem>>, vector<128x128xf32>
      tpu.vector_store %arg5[%c0_18, %c0_19], %34 {strides = array<i32>} : memref<128x128xf32, #tpu.memory_space<vmem>>, vector<128x128xf32>,
      %36 = tpu.iota {dimensions = array<i32: 0>} : vector<128x128xi32>
      %37 = vector.broadcast %0 : i32 to vector<128x128xi32>
      %38 = arith.addi %36, %37 : vector<128x128xi32>
      %c256_i32 = arith.constant 256 : i32
      %39 = vector.broadcast %c256_i32 : i32 to vector<128x128xi32>
      %40 = arith.cmpi slt, %38, %39 : vector<128x128xi32>
      %41 = arith.andi %40, %18 : vector<128x128xi1>
      %cst_20 = arith.constant 0.000000e+00 : f32
      %42 = vector.broadcast %cst_20 : f32 to vector<128x128xf32>
      %43 = arith.select %41, %15, %42 : vector<128x128xi1>, vector<128x128xf32>
      %44 = vector.shape_cast %43 : vector<128x128xf32> to vector<1x128x128xf32>
      %cst_21 = arith.constant dense<0.000000e+00> : vector<1xf32>
      %45 = vector.multi_reduction <add>, %44, %cst_21 [1, 2] : vector<1x128x128xf32> to vector<1xf32>
      %46 = vector.shape_cast %45 : vector<1xf32> to vector<1x1x1xf32>
      %47 = vector.extract %46[0, 0, 0] : f32 from vector<1x1x1xf32>
      %48 = arith.mulf %43, %43 : vector<128x128xf32>
      %49 = vector.shape_cast %48 : vector<128x128xf32> to vector<1x128x128xf32>
      %cst_22 = arith.constant dense<0.000000e+00> : vector<1xf32>
      %50 = vector.multi_reduction <add>, %49, %cst_22 [1, 2] : vector<1x128x128xf32> to vector<1xf32>
      %51 = vector.shape_cast %50 : vector<1xf32> to vector<1x1x1xf32>
      %52 = vector.extract %51[0, 0, 0] : f32 from vector<1x1x1xf32>
      %53 = vector.broadcast %47 : f32 to vector<1x8x128xf32>
      %c0_23 = arith.constant 0 : index
      %c0_24 = arith.constant 0 : index
      %c0_25 = arith.constant 0 : index
      %54 = vector.load %arg6[%c0_23, %c0_24, %c0_25] : memref<1x8x128xf32, #tpu.memory_space<vmem>>, vector<1x8x128xf32>
      tpu.vector_store %arg6[%c0_23, %c0_24, %c0_25], %53 {strides = array<i32>} : memref<1x8x128xf32, #tpu.memory_space<vmem>>, vector<1x8x128xf32>,
      %55 = vector.broadcast %52 : f32 to vector<1x8x128xf32>
      %c0_26 = arith.constant 0 : index
      %c0_27 = arith.constant 0 : index
      %c0_28 = arith.constant 0 : index
      %56 = vector.load %arg7[%c0_26, %c0_27, %c0_28] : memref<1x8x128xf32, #tpu.memory_space<vmem>>, vector<1x8x128xf32>
      tpu.vector_store %arg7[%c0_26, %c0_27, %c0_28], %55 {strides = array<i32>} : memref<1x8x128xf32, #tpu.memory_space<vmem>>, vector<1x8x128xf32>,
    } else {
    }
    return
  }
  func.func @transform_0(%arg0: i32, %arg1: i32) -> (i32, i32) {
    %c0_i32 = arith.constant 0 : i32
    return %arg0, %arg1 : i32, i32
  }
  func.func @transform_1(%arg0: i32, %arg1: i32) -> (i32, i32) {
    %c0_i32 = arith.constant 0 : i32
    %c0_i32_0 = arith.constant 0 : i32
    return %arg1, %c0_i32 : i32, i32
  }
  func.func @transform_2(%arg0: i32, %arg1: i32) -> (i32, i32) {
    %c0_i32 = arith.constant 0 : i32
    %c0_i32_0 = arith.constant 0 : i32
    return %arg0, %c0_i32 : i32, i32
  }
  func.func @transform_3(%arg0: i32, %arg1: i32) -> (i32, i32) {
    %c0_i32 = arith.constant 0 : i32
    %c0_i32_0 = arith.constant 0 : i32
    return %arg0, %c0_i32 : i32, i32
  }
  func.func @transform_4(%arg0: i32, %arg1: i32) -> (i32, i32, i32) {
    %c0_i32 = arith.constant 0 : i32
    %c0_i32_0 = arith.constant 0 : i32
    %c0_i32_1 = arith.constant 0 : i32
    return %arg0, %c0_i32, %c0_i32_0 : i32, i32, i32
  }
  func.func @transform_5(%arg0: i32, %arg1: i32) -> (i32, i32, i32) {
    %c0_i32 = arith.constant 0 : i32
    %c0_i32_0 = arith.constant 0 : i32
    %c0_i32_1 = arith.constant 0 : i32
    return %arg0, %c0_i32, %c0_i32_0 : i32, i32, i32
  }
}

</mosaic_0001>

<bundles_post_ra>
// kernel: sage_forward.4
= control target key start
LH: loop header
LB: loop body
LE: loop exit
PB: predicated region body
PF: predicated region fallthrough
CT: control target
= control target key end

     0   :  { %s614_s12 = smov 0   ;;  %s725_s0 = inlined_call_operand.vmem [shape: f32[256,128], index: 0, kind: input, shape index: {}]   ;;  %s726_s1 = inlined_call_operand.vmem [shape: f32[128,128], index: 1, kind: input, shape index: {}]   ;;  %s727_s2 = inlined_call_operand.vmem [shape: f32[1,128], index: 2, kind: input, shape index: {}]   ;;  %s728_s3 = inlined_call_operand.vmem [shape: f32[256,128], index: 3, kind: output, shape index: {}]  }
   0x1 LB: > { %s430_s13 = sadd.s32 4294967295, %s592_s12   ;;  %p434_p0 = scmp.ge.s32.totalorder %s592_s12, 1  ;;  %s592_s12 = sphi %s614_s12, %s13_s12  }
   0x2   : > { %p138_p1 = scmp.lt.s32.totalorder %s592_s12, 3 }
   0x4   : > { %p139_p2 = pnand %p434_p0, %p138_p1 }
   0x5   : > { %v190_v0 = vld [vmem:[%s726_s1] sm:$0xff] (!%p139_p2)  ;;  %v191_v1 = vld [vmem:[%s726_s1 + $0x8] sm:$0xff] (!%p139_p2)  ;;  %v192_v2 = vld [vmem:[%s726_s1 + $0x10] sm:$0xff] (!%p139_p2)  ;;  %s435_s20 = sshll.u32 (!%p139_p2), %s430_s13, 4 }
   0x6   : > { %142 = sbr.rel (%p139_p2) target bundleno = 269 (0x10d), region = 32  ;;  %v530_v3 = vpack.c.bf16 (!%p139_p2), %v191_v1, %v190_v0  ;;  %v193_v4 = vld [vmem:[%s726_s1 + $0x18] sm:$0xff] (!%p139_p2)  ;;  %p163_p3 = scmp.lt.s32.totalorder (!%p139_p2), %s435_s20, 31  ;;  %v194_v6 = vld [vmem:[%s726_s1 + $0x20] sm:$0xff] (!%p139_p2)  ;;  %v195_v7 = vld [vmem:[%s726_s1 + $0x28] sm:$0xff] (!%p139_p2) }
   0x7   : > { %v534_v5 = vpack.c.bf16 (!%p139_p2), %v193_v4, %v192_v2  ;;  %v538_v8 = vpack.c.bf16 (!%p139_p2), %v195_v7, %v194_v6  ;;  %v196_v9 = vld [vmem:[%s726_s1 + $0x30] sm:$0xff] (!%p139_p2)  ;;  %v197_v10 = vld [vmem:[%s726_s1 + $0x38] sm:$0xff] (!%p139_p2)  ;;  %v198_v14 = vld [vmem:[%s726_s1 + $0x40] sm:$0xff] (!%p139_p2) }
   0x8   : > { %531 = vmatprep.subr.bf16.mxu0 (!%p139_p2), %v530_v3  ;;  %562 = vmatprep.subr.bf16.mxu1 (!%p139_p2), %v530_v3  ;;  %v542_v13 = vpack.c.bf16 (!%p139_p2), %v197_v10, %v196_v9  ;;  %v199_v15 = vld [vmem:[%s726_s1 + $0x48] sm:$0xff] (!%p139_p2)  ;;  %v200_v17 = vld [vmem:[%s726_s1 + $0x50] sm:$0xff] (!%p139_p2)  ;;  %v201_v18 = vld [vmem:[%s726_s1 + $0x58] sm:$0xff] (!%p139_p2) }
   0x9   : > { %533 = vmatpush3.bf16.msra.mxu0 (!%p139_p2), %v530_v3  ;;  %570 = vmatpush3.bf16.msra.mxu1 (!%p139_p2), %v530_v3  ;;  %v546_v16 = vpack.c.bf16 (!%p139_p2), %v199_v15, %v198_v14  ;;  %v550_v19 = vpack.c.bf16 (!%p139_p2), %v201_v18, %v200_v17  ;;  %v202_v20 = vld [vmem:[%s726_s1 + $0x60] sm:$0xff] (!%p139_p2)  ;;  %v203_v21 = vld [vmem:[%s726_s1 + $0x68] sm:$0xff] (!%p139_p2)  ;;  %v204_v23 = vld [vmem:[%s726_s1 + $0x70] sm:$0xff] (!%p139_p2) }
   0xa   : > { %535 = vmatprep.subr.bf16.mxu0 (!%p139_p2), %v534_v5  ;;  %563 = vmatprep.subr.bf16.mxu1 (!%p139_p2), %v534_v5  ;;  %v554_v22 = vpack.c.bf16 (!%p139_p2), %v203_v21, %v202_v20  ;;  %v205_v24 = vld [vmem:[%s726_s1 + $0x78] sm:$0xff] (!%p139_p2)  ;;  %v439_v40 = vld [vmem:[%s727_s2] ss:$0 sm:$0xff] (!%p139_p2) }
   0xb   : > { %v558_v25 = vpack.c.bf16 (!%p139_p2), %v205_v24, %v204_v23 }
   0xd   : > { %s730_s20 = smov (!%p163_p3, %s435_s20), 31  ;;  %537 = vmatpush3.bf16.msra.mxu0 %v534_v5  ;;  %571 = vmatpush3.bf16.msra.mxu1 %v534_v5 }
   0xe   : > { %s436_s27 = sshll.u32 %s730_s20, 3  ;;  %539 = vmatprep.subr.bf16.mxu0 %v538_v8  ;;  %564 = vmatprep.subr.bf16.mxu1 %v538_v8 }
   0xf   : > { %s654_s7 = scalar_lea.vmem %s725_s0, %s436_s27  ;;  %s704_s4 = scalar_lea.vmem %s728_s3, %s436_s27 }
  0x10   : > { %v174_v11 = vld [vmem:[%s654_s7] sm:$0xff]  ;;  %v175_v26 = vld [vmem:[%s654_s7 + $0x8] sm:$0xff]  ;;  %v176_v28 = vld [vmem:[%s654_s7 + $0x10] sm:$0xff] }
  0x11   : > { %v182_v12 = vld [vmem:[%s654_s7 + $0x40] sm:$0xff]  ;;  %506 = vmatprep.mubr.f32.mxu0 %v174_v11  ;;  %541 = vmatpush3.bf16.msra.mxu0 %v538_v8  ;;  %v183_v27 = vld [vmem:[%s654_s7 + $0x48] sm:$0xff]  ;;  %v184_v29 = vld [vmem:[%s654_s7 + $0x50] sm:$0xff] }
  0x12   : > { %518 = vmatprep.mubr.f32.mxu1 %v182_v12  ;;  %572 = vmatpush3.bf16.msra.mxu1 %v538_v8  ;;  %v177_v30 = vld [vmem:[%s654_s7 + $0x18] sm:$0xff]  ;;  %v178_v32 = vld [vmem:[%s654_s7 + $0x20] sm:$0xff]  ;;  %v179_v34 = vld [vmem:[%s654_s7 + $0x28] sm:$0xff] }
  0x13   : > { %543 = vmatprep.subr.bf16.mxu0 %v542_v13  ;;  %565 = vmatprep.subr.bf16.mxu1 %v542_v13  ;;  %v185_v31 = vld [vmem:[%s654_s7 + $0x58] sm:$0xff]  ;;  %v186_v33 = vld [vmem:[%s654_s7 + $0x60] sm:$0xff]  ;;  %v187_v35 = vld [vmem:[%s654_s7 + $0x68] sm:$0xff] }
  0x14   : > { %v180_v36 = vld [vmem:[%s654_s7 + $0x30] sm:$0xff]  ;;  %v181_v38 = vld [vmem:[%s654_s7 + $0x38] sm:$0xff] }
  0x15   : > { %545 = vmatpush3.bf16.msra.mxu0 %v542_v13  ;;  %v188_v37 = vld [vmem:[%s654_s7 + $0x70] sm:$0xff]  ;;  %v189_v39 = vld [vmem:[%s654_s7 + $0x78] sm:$0xff] }
  0x16   : > { %573 = vmatpush3.bf16.msra.mxu1 %v542_v13  ;;  %547 = vmatprep.subr.bf16.mxu0 %v546_v16 }
  0x17   : > { %566 = vmatprep.subr.bf16.mxu1 %v546_v16 }
  0x19   : > { %549 = vmatpush3.bf16.msra.mxu0 %v546_v16 }
  0x1a   : > { %574 = vmatpush3.bf16.msra.mxu1 %v546_v16  ;;  %551 = vmatprep.subr.bf16.mxu0 %v550_v19 }
  0x1b   : > { %567 = vmatprep.subr.bf16.mxu1 %v550_v19 }
  0x1d   : > { %553 = vmatpush3.bf16.msra.mxu0 %v550_v19 }
  0x1e   : > { %575 = vmatpush3.bf16.msra.mxu1 %v550_v19  ;;  %555 = vmatprep.subr.bf16.mxu0 %v554_v22 }
  0x1f   : > { %568 = vmatprep.subr.bf16.mxu1 %v554_v22 }
  0x21   : > { %557 = vmatpush3.bf16.msra.mxu0 %v554_v22 }
  0x22   : > { %576 = vmatpush3.bf16.msra.mxu1 %v554_v22  ;;  %559 = vmatprep.subr.bf16.mxu0 %v558_v25 }
  0x23   : > { %569 = vmatprep.subr.bf16.mxu1 %v558_v25 }
  0x25   : > { %561 = vmatpush3.bf16.msra.mxu0 %v558_v25 }
  0x26   : > { %577 = vmatpush3.bf16.msra.mxu1 %v558_v25 }
  0x28   : > { %507 = vmatmul.mubr.f32.vlgmr.msra.gmra.mrb[0].mxu0 %v175_v26 }
  0x29   : > { %519 = vmatmul.mubr.f32.vlgmr.msra.gmra.mrb[0].mxu1 %v183_v27  ;;  %509 = vmatprep.mubr.f32.mxu0 %v176_v28 }
  0x2a   : > { %521 = vmatprep.mubr.f32.mxu1 %v184_v29 }
  0x2c   : > { %510 = vmatmul.mubr.f32.gmra.mrb[2].mxu0 %v177_v30 }
  0x2d   : > { %522 = vmatmul.mubr.f32.gmra.mrb[2].mxu1 %v185_v31  ;;  %512 = vmatprep.mubr.f32.mxu0 %v178_v32 }
  0x2e   : > { %524 = vmatprep.mubr.f32.mxu1 %v186_v33 }
  0x30   : > { %513 = vmatmul.mubr.f32.gmra.mrb[4].mxu0 %v179_v34 }
  0x31   : > { %525 = vmatmul.mubr.f32.gmra.mrb[4].mxu1 %v187_v35  ;;  %515 = vmatprep.mubr.f32.mxu0 %v180_v36 }
  0x32   : > { %527 = vmatprep.mubr.f32.mxu1 %v188_v37 }
  0x34   : > { %516 = vmatmul.mubr.f32.gmra.mrb[6].mxu0 %v181_v38 }
  0x35   : > { %528 = vmatmul.mubr.f32.gmra.mrb[6].mxu1 %v189_v39 }
  0xfb   : > { %v508_v41 = vpop.f32.mrb[0].mxu0 }
  0xfc   : > { %v520_v42 = vpop.f32.mrb[0].mxu1  ;;  %v285_v43 = vadd.f32 %v508_v41, %v439_v40  ;;  %v279_v45 = vpop.f32.mrb[1].mxu0 }
  0xfd   : > { %v325_v44 = vadd.f32 %v520_v42, %v439_v40  ;;  %v319_v46 = vpop.f32.mrb[1].mxu1  ;;  %v280_v47 = vadd.f32 %v439_v40, %v279_v45 }
  0xfe   : > { %v320_v48 = vadd.f32 %v439_v40, %v319_v46  ;;  %359 = vst [vmem:[%s704_s4 + $0x8] sm:$0xff] %v285_v43 }
  0xff   : > { %367 = vst [vmem:[%s704_s4 + $0x48] sm:$0xff] %v325_v44  ;;  %358 = vst [vmem:[%s704_s4] sm:$0xff] %v280_v47  ;;  %v511_v49 = vpop.f32.mrb[2].mxu0 }
 0x100   : > { %366 = vst [vmem:[%s704_s4 + $0x40] sm:$0xff] %v320_v48  ;;  %v523_v50 = vpop.f32.mrb[2].mxu1  ;;  %v295_v51 = vadd.f32 %v511_v49, %v439_v40  ;;  %v289_v53 = vpop.f32.mrb[3].mxu0 }
 0x101   : > { %v335_v52 = vadd.f32 %v523_v50, %v439_v40  ;;  %v329_v54 = vpop.f32.mrb[3].mxu1  ;;  %v290_v55 = vadd.f32 %v439_v40, %v289_v53 }
 0x102   : > { %v330_v56 = vadd.f32 %v439_v40, %v329_v54  ;;  %361 = vst [vmem:[%s704_s4 + $0x18] sm:$0xff] %v295_v51 }
 0x103   : > { %369 = vst [vmem:[%s704_s4 + $0x58] sm:$0xff] %v335_v52  ;;  %360 = vst [vmem:[%s704_s4 + $0x10] sm:$0xff] %v290_v55  ;;  %v514_v57 = vpop.f32.mrb[4].mxu0 }
 0x104   : > { %368 = vst [vmem:[%s704_s4 + $0x50] sm:$0xff] %v330_v56  ;;  %v526_v58 = vpop.f32.mrb[4].mxu1  ;;  %v305_v59 = vadd.f32 %v514_v57, %v439_v40  ;;  %v299_v61 = vpop.f32.mrb[5].mxu0 }
 0x105   : > { %v345_v60 = vadd.f32 %v526_v58, %v439_v40  ;;  %v339_v62 = vpop.f32.mrb[5].mxu1  ;;  %v300_v63 = vadd.f32 %v439_v40, %v299_v61 }
 0x106   : > { %v340_v0 = vadd.f32 %v439_v40, %v339_v62  ;;  %363 = vst [vmem:[%s704_s4 + $0x28] sm:$0xff] %v305_v59 }
 0x107   : > { %371 = vst [vmem:[%s704_s4 + $0x68] sm:$0xff] %v345_v60  ;;  %362 = vst [vmem:[%s704_s4 + $0x20] sm:$0xff] %v300_v63  ;;  %v517_v1 = vpop.f32.mrb[6].mxu0 }
 0x108   : > { %370 = vst [vmem:[%s704_s4 + $0x60] sm:$0xff] %v340_v0  ;;  %v529_v2 = vpop.f32.mrb[6].mxu1  ;;  %v315_v3 = vadd.f32 %v517_v1, %v439_v40  ;;  %v309_v5 = vpop.f32.mrb[7].mxu0 }
 0x109   : > { %v355_v4 = vadd.f32 %v529_v2, %v439_v40  ;;  %v349_v6 = vpop.f32.mrb[7].mxu1  ;;  %v310_v7 = vadd.f32 %v439_v40, %v309_v5 }
 0x10a   : > { %v350_v8 = vadd.f32 %v439_v40, %v349_v6  ;;  %365 = vst [vmem:[%s704_s4 + $0x38] sm:$0xff] %v315_v3 }
 0x10b   : > { %373 = vst [vmem:[%s704_s4 + $0x78] sm:$0xff] %v355_v4  ;;  %364 = vst [vmem:[%s704_s4 + $0x30] sm:$0xff] %v310_v7 }
 0x10c   : > { %372 = vst [vmem:[%s704_s4 + $0x70] sm:$0xff] %v350_v8 }
 0x10d PF: > { %s13_s12 = sadd.s32 1, %s592_s12  }
 0x10e   : > { %p10_p4 = scmp.ge.s32.totalorder %s13_s12, 4  }
 0x110   :  { %12 = sbr.rel (!%p10_p4) target bundleno = 1 (0x1), region = 62 }

// kernel: sage_forward.5
= control target key start
LH: loop header
LB: loop body
LE: loop exit
PB: predicated region body
PF: predicated region fallthrough
CT: control target
= control target key end

     0   :  { %s1489_s21 = smov 0   ;;  %s1491_s22 = smov 0   ;;  %s1750_s0 = inlined_call_operand.vmem [shape: bf16[256,256], index: 0, kind: input, shape index: {}]   ;;  %s1751_s1 = inlined_call_operand.vmem [shape: bf16[256,128], index: 1, kind: input, shape index: {}]   ;;  %s1752_s2 = inlined_call_operand.vmem [shape: f32[128,128], index: 2, kind: input, shape index: {}]   ;;  %s1753_s3 = inlined_call_operand.vmem [shape: f32[256,128], index: 3, kind: input, shape index: {}]   ;;  %s1754_s4 = inlined_call_operand.vmem [shape: f32[1,128], index: 4, kind: input, shape index: {}]   ;;  %s1755_s5 = inlined_call_operand.vmem [shape: f32[1,128], index: 5, kind: input, shape index: {}]   ;;  %s1756_s6 = inlined_call_operand.vmem [shape: f32[256,128], index: 6, kind: output, shape index: {}]  }
   0x1   :  { %s1493_s23 = smov 0   ;;  %s1495_s24 = smov 0  }
   0x2   :  { %s1497_s25 = smov 0   ;;  %s1499_s26 = smov 0  }
   0x3   :  { %s1501_s27 = smov 0  }
   0x4 LB: > { %s25_s28 = sadd.s32 1, %s1443_s25  ;;  %s28_s29 = sadd.s32 1, %s1447_s26  ;;  %s1451_s27 = sphi %s1501_s27, %s16_s27   ;;  %s1447_s26 = sphi %s1499_s26, %s1762_s26   ;;  %s1443_s25 = sphi %s1497_s25, %s1761_s25   ;;  %s1439_s24 = sphi %s1495_s24, %s1760_s24   ;;  %s1435_s23 = sphi %s1493_s23, %s1759_s23   ;;  %s1431_s22 = sphi %s1491_s22, %s1758_s22   ;;  %s1427_s21 = sphi %s1489_s21, %s1757_s21  }
   0x5   : > { %p26_p0 = scmp.ge.s32.totalorder %s25_s28, 2  ;;  %p44_p1 = scmp.ne.s32.totalorder %s1431_s22, %s1427_s21 }
   0x6   : > { %p45_p2 = scmp.eq.s32.totalorder %s1451_s27, 0  ;;  %s37_s9 = sadd.s32 1, %s1431_s22 }
   0x7   : > { %s1764_s28 = smov (%p26_p0, %s25_s28), 0  ;;  %s1766_s29 = smov (!%p26_p0, %s28_s29), %s1447_s26 }
   0x8   : > { %p46_p3 = por %p45_p2, %p44_p1  ;;  %p30_p4 = scmp.ge.s32.totalorder %s1766_s29, 2 }
   0x9   : > { %s33_s30 = ssub.s32 %s1443_s25, %s1764_s28  ;;  %p1088_p6 = scmp.ge.s32.totalorder %s1451_s27, 4 }
   0xa   : > { %s1768_s29 = smov (%p30_p4, %s1766_s29), 0 }
   0xb   : > { %s32_s7 = ssub.s32 %s1447_s26, %s1768_s29  ;;  %220 = sbr.rel (%p1088_p6) target bundleno = 34 (0x22), region = 28 }
   0xc   : > { %s34_s8 = sor.u32 %s33_s30, %s32_s7 }
   0xd   : > { %p35_p5 = scmp.eq.s32.totalorder %s34_s8, 0 }
   0xf   : > { %s1540_s10 = scalar_select %p35_p5, %s1431_s22, %s37_s9  }
  0x12   : > { %223 = sbr.rel (!%p46_p3) target bundleno = 34 (0x22), region = 32  ;;  %s225_s11 = sand.u32 (%p46_p3), 1, %s1431_s22  }
  0x13   : > { %s1123_s12 = sshll.u32 (%p46_p3), %s1447_s26, 5  ;;  %s1089_s13 = sshll.u32 (%p46_p3), %s225_s11, 6 }
  0x14   : > { %s230_s14 = sadd.s32 (%p46_p3), %s1443_s25, %s1123_s12  ;;  %s227_s19 = scalar_lea.vmem (%p46_p3), [#allocation3], %s1089_s13 }
  0x15   : > { %s1092_s15 = sshll.u32 (%p46_p3), %s230_s14, 2 }
  0x16   : > { %s1549_s18 = scalar_lea.vmem (%p46_p3), %s1750_s0, %s1092_s15 }
  0x17   : > { %v248_v0 = vld [vmem:[%s1549_s18] sm:$0xf] (%p46_p3)  ;;  %v250_v1 = vld [vmem:[%s1549_s18 + $0x8] sm:$0xf] (%p46_p3)  ;;  %v252_v2 = vld [vmem:[%s1549_s18 + $0x10] sm:$0xf] (%p46_p3) }
  0x18   : > { %249 = vst [vmem:[%s227_s19] sm:$0xf] (%p46_p3), %v248_v0  ;;  %251 = vst [vmem:[%s227_s19 + $0x4] sm:$0xf] (%p46_p3), %v250_v1  ;;  %v254_v3 = vld [vmem:[%s1549_s18 + $0x18] sm:$0xf] (%p46_p3) }
  0x19   : > { %253 = vst [vmem:[%s227_s19 + $0x8] sm:$0xf] %v252_v2  ;;  %v256_v4 = vld [vmem:[%s1549_s18 + $0x20] sm:$0xf]  ;;  %v258_v5 = vld [vmem:[%s1549_s18 + $0x28] sm:$0xf] }
  0x1a   : > { %255 = vst [vmem:[%s227_s19 + $0xc] sm:$0xf] %v254_v3  ;;  %257 = vst [vmem:[%s227_s19 + $0x10] sm:$0xf] %v256_v4  ;;  %v260_v6 = vld [vmem:[%s1549_s18 + $0x30] sm:$0xf] }
  0x1b   : > { %259 = vst [vmem:[%s227_s19 + $0x14] sm:$0xf] %v258_v5  ;;  %v262_v7 = vld [vmem:[%s1549_s18 + $0x38] sm:$0xf]  ;;  %v264_v8 = vld [vmem:[%s1549_s18 + $0x40] sm:$0xf] }
  0x1c   : > { %261 = vst [vmem:[%s227_s19 + $0x18] sm:$0xf] %v260_v6  ;;  %263 = vst [vmem:[%s227_s19 + $0x1c] sm:$0xf] %v262_v7  ;;  %v266_v9 = vld [vmem:[%s1549_s18 + $0x48] sm:$0xf] }
  0x1d   : > { %265 = vst [vmem:[%s227_s19 + $0x20] sm:$0xf] %v264_v8  ;;  %v268_v10 = vld [vmem:[%s1549_s18 + $0x50] sm:$0xf]  ;;  %v270_v11 = vld [vmem:[%s1549_s18 + $0x58] sm:$0xf] }
  0x1e   : > { %267 = vst [vmem:[%s227_s19 + $0x24] sm:$0xf] %v266_v9  ;;  %269 = vst [vmem:[%s227_s19 + $0x28] sm:$0xf] %v268_v10  ;;  %v272_v12 = vld [vmem:[%s1549_s18 + $0x60] sm:$0xf] }
  0x1f   : > { %271 = vst [vmem:[%s227_s19 + $0x2c] sm:$0xf] %v270_v11  ;;  %v274_v13 = vld [vmem:[%s1549_s18 + $0x68] sm:$0xf]  ;;  %v276_v14 = vld [vmem:[%s1549_s18 + $0x70] sm:$0xf] }
  0x20   : > { %273 = vst [vmem:[%s227_s19 + $0x30] sm:$0xf] %v272_v12  ;;  %275 = vst [vmem:[%s227_s19 + $0x34] sm:$0xf] %v274_v13  ;;  %v278_v15 = vld [vmem:[%s1549_s18 + $0x78] sm:$0xf] }
  0x21   : > { %277 = vst [vmem:[%s227_s19 + $0x38] sm:$0xf] %v276_v14  ;;  %279 = vst [vmem:[%s227_s19 + $0x3c] sm:$0xf] %v278_v15 }
  0x22 PF: > { %p1093_p7 = scmp.ge.s32.totalorder %s1451_s27, 1  ;;  %p351_p8 = scmp.lt.s32.totalorder %s1451_s27, 5 }
  0x24   : > { %p352_p9 = pnand %p1093_p7, %p351_p8 }
  0x25   : > { %s358_s20 = sand.u32 (!%p352_p9), 1, %s1427_s21   ;;  %s1095_s30 = sshll.u32 (!%p352_p9), %s1435_s23, 4 }
  0x26   : > { %355 = sbr.rel (%p352_p9) target bundleno = 553 (0x229), region = 81  ;;  %s1094_s7 = sshll.u32 (!%p352_p9), %s358_s20, 6 }
  0x27   : > { %p399_p10 = scmp.lt.s32.totalorder (!%p352_p9), %s1095_s30, 31  ;;  %s1097_s8 = sshll.u32 (!%p352_p9), %s1439_s24, 4 }
  0x28   : > { %p405_p11 = scmp.lt.s32.totalorder (!%p352_p9), %s1097_s8, 31  ;;  %s1587_s24 = scalar_lea.vmem (!%p352_p9), [#allocation3], %s1094_s7 }
  0x29   : > { %p1101_p12 = scmp.ne.s32.totalorder (!%p352_p9), %s1435_s23, 0 }
  0x2d   : > { %s1770_s30 = smov (!%p399_p10, %s1095_s30), 31  ;;  %s1772_s8 = smov (!%p405_p11, %s1097_s8), 31 }
  0x2e   : > { %s1096_s9 = sshll.u32 %s1770_s30, 2  ;;  %s1098_s14 = sshll.u32 %s1772_s8, 3  ;;  %v1453_v16 = vmov (!%p1101_p12), 0.0  }
  0x2f   : > { %s1575_s13 = scalar_lea.vmem %s1751_s1, %s1096_s9  ;;  %s1580_s17 = scalar_lea.vmem %s1753_s3, %s1098_s14  ;;  %421 = vst [vmem:[#allocation2] sm:$0xff] (!%p1101_p12), %v1453_v16  ;;  %422 = vst [vmem:[#allocation2 + $0x8] sm:$0xff] (!%p1101_p12), %v1453_v16 }
  0x30   : > { %s1585_s19 = scalar_lea.vmem %s1756_s6, %s1098_s14  ;;  %420 = sbr.rel (%p1101_p12) target bundleno = 55 (0x37), region = 89  ;;  %423 = vst [vmem:[#allocation2 + $0x10] sm:$0xff] (!%p1101_p12), %v1453_v16  ;;  %424 = vst [vmem:[#allocation2 + $0x18] sm:$0xff] (!%p1101_p12), %v1453_v16 }
  0x31   : > { %425 = vst [vmem:[#allocation2 + $0x20] sm:$0xff] (!%p1101_p12), %v1453_v16  ;;  %426 = vst [vmem:[#allocation2 + $0x28] sm:$0xff] (!%p1101_p12), %v1453_v16 }
  0x32   : > { %427 = vst [vmem:[#allocation2 + $0x30] sm:$0xff] (!%p1101_p12), %v1453_v16  ;;  %428 = vst [vmem:[#allocation2 + $0x38] sm:$0xff] (!%p1101_p12), %v1453_v16 }
  0x33   : > { %429 = vst [vmem:[#allocation2 + $0x40] sm:$0xff] (!%p1101_p12), %v1453_v16  ;;  %430 = vst [vmem:[#allocation2 + $0x48] sm:$0xff] (!%p1101_p12), %v1453_v16 }
  0x34   : > { %431 = vst [vmem:[#allocation2 + $0x50] sm:$0xff] (!%p1101_p12), %v1453_v16  ;;  %432 = vst [vmem:[#allocation2 + $0x58] sm:$0xff] (!%p1101_p12), %v1453_v16 }
  0x35   : > { %433 = vst [vmem:[#allocation2 + $0x60] sm:$0xff] (!%p1101_p12), %v1453_v16  ;;  %434 = vst [vmem:[#allocation2 + $0x68] sm:$0xff] (!%p1101_p12), %v1453_v16 }
  0x36   : > { %435 = vst [vmem:[#allocation2 + $0x70] sm:$0xff] (!%p1101_p12), %v1453_v16  ;;  %436 = vst [vmem:[#allocation2 + $0x78] sm:$0xff] (!%p1101_p12), %v1453_v16 }
  0x37 PF: > { %v1381_v17 = vld [vmem:[%s1575_s13] sm:$0xff]   ;;  %v1382_v18 = vld [vmem:[%s1575_s13 + $0x8] sm:$0xff]   ;;  %v1383_v19 = vld [vmem:[%s1575_s13 + $0x10] sm:$0xff]   ;;  %p1118_p13 = scmp.ne.s32.totalorder %s1435_s23, 1 }
  0x38   : > { %1172 = vmatprep.subr.bf16.mxu0 %v1381_v17  ;;  %1292 = vmatprep.subr.bf16.mxu1 %v1381_v17  ;;  %v1384_v20 = vld [vmem:[%s1575_s13 + $0x18] sm:$0xff]   ;;  %v1389_v21 = vld [vmem:[%s1587_s24] sm:$0xff]   ;;  %v1386_v24 = vld [vmem:[%s1575_s13 + $0x28] sm:$0xff]  }
  0x39   : > { %1173 = vmatpush3.bf16.msra.mxu0 %v1381_v17  ;;  %1300 = vmatpush3.bf16.msra.mxu1 %v1381_v17  ;;  %v1390_v22 = vld [vmem:[%s1587_s24 + $0x20] sm:$0xff]   ;;  %v1387_v25 = vld [vmem:[%s1575_s13 + $0x30] sm:$0xff]   ;;  %v1388_v26 = vld [vmem:[%s1575_s13 + $0x38] sm:$0xff]  }
  0x3a   : > { %1174 = vmatprep.subr.bf16.mxu0 %v1382_v18  ;;  %1293 = vmatprep.subr.bf16.mxu1 %v1382_v18  ;;  %v1385_v23 = vld [vmem:[%s1575_s13 + $0x20] sm:$0xff]   ;;  %v1391_v27 = vld [vmem:[%s1587_s24 + $0x8] sm:$0xff]   ;;  %v1393_v29 = vld [vmem:[%s1587_s24 + $0x10] sm:$0xff]  }
  0x3b   : > { %1188 = vmatprep.mubr.bf16.mxu0 %v1389_v21  ;;  %1196 = vmatprep.mubr.bf16.mxu1 %v1390_v22  ;;  %v1392_v28 = vld [vmem:[%s1587_s24 + $0x28] sm:$0xff]   ;;  %v1394_v30 = vld [vmem:[%s1587_s24 + $0x30] sm:$0xff]   ;;  %v1395_v31 = vld [vmem:[%s1587_s24 + $0x18] sm:$0xff]  }
  0x3c   : > { %v1396_v32 = vld [vmem:[%s1587_s24 + $0x38] sm:$0xff]   ;;  %v439_v33 = vld [vmem:[#allocation2 + $0x10] sm:$0xff]  ;;  %v437_v35 = vld [vmem:[#allocation2] sm:$0xff] }
  0x3d   : > { %1175 = vmatpush3.bf16.msra.mxu0 %v1382_v18  ;;  %1301 = vmatpush3.bf16.msra.mxu1 %v1382_v18  ;;  %v447_v34 = vld [vmem:[#allocation2 + $0x50] sm:$0xff]  ;;  %v445_v36 = vld [vmem:[#allocation2 + $0x40] sm:$0xff]  ;;  %v440_v39 = vld [vmem:[#allocation2 + $0x18] sm:$0xff] }
  0x3e   : > { %1176 = vmatprep.subr.bf16.mxu0 %v1383_v19  ;;  %1294 = vmatprep.subr.bf16.mxu1 %v1383_v19  ;;  %v448_v40 = vld [vmem:[#allocation2 + $0x58] sm:$0xff]  ;;  %v438_v45 = vld [vmem:[#allocation2 + $0x8] sm:$0xff]  ;;  %v443_v57 = vld [vmem:[#allocation2 + $0x30] sm:$0xff] }
  0x3f   : > { %v446_v46 = vld [vmem:[#allocation2 + $0x48] sm:$0xff]  ;;  %v451_v58 = vld [vmem:[#allocation2 + $0x70] sm:$0xff]  ;;  %v441_v59 = vld [vmem:[#allocation2 + $0x20] sm:$0xff] }
  0x40   : > { %v449_v60 = vld [vmem:[#allocation2 + $0x60] sm:$0xff]  ;;  %v444_v63 = vld [vmem:[#allocation2 + $0x38] sm:$0xff]  ;;  %v442_v5 = vld [vmem:[#allocation2 + $0x28] sm:$0xff] }
  0x41   : > { %1177 = vmatpush3.bf16.msra.mxu0 %v1383_v19  ;;  %1302 = vmatpush3.bf16.msra.mxu1 %v1383_v19  ;;  %v452_v0 = vld [vmem:[#allocation2 + $0x78] sm:$0xff]  ;;  %v450_v6 = vld [vmem:[#allocation2 + $0x68] sm:$0xff]  ;;  %v730_v17 = vld [vmem:[%s1752_s2] sm:$0xff] (!%p1118_p13) }
  0x42   : > { %1178 = vmatprep.subr.bf16.mxu0 %v1384_v20  ;;  %1295 = vmatprep.subr.bf16.mxu1 %v1384_v20  ;;  %v731_v18 = vld [vmem:[%s1752_s2 + $0x8] sm:$0xff] (!%p1118_p13)  ;;  %v732_v19 = vld [vmem:[%s1752_s2 + $0x10] sm:$0xff] (!%p1118_p13)  ;;  %v733_v21 = vld [vmem:[%s1752_s2 + $0x18] sm:$0xff] (!%p1118_p13) }
  0x43   : > { %v1264_v22 = vpack.c.bf16 (!%p1118_p13), %v733_v21, %v732_v19 }
  0x45   : > { %1179 = vmatpush3.bf16.msra.mxu0 %v1384_v20  ;;  %1303 = vmatpush3.bf16.msra.mxu1 %v1384_v20  ;;  %v1260_v20 = vpack.c.bf16 (!%p1118_p13), %v731_v18, %v730_v17 }
  0x46   : > { %1180 = vmatprep.subr.bf16.mxu0 %v1385_v23  ;;  %1296 = vmatprep.subr.bf16.mxu1 %v1385_v23 }
  0x49   : > { %1181 = vmatpush3.bf16.msra.mxu0 %v1385_v23  ;;  %1304 = vmatpush3.bf16.msra.mxu1 %v1385_v23  ;;  %v734_v23 = vld [vmem:[%s1752_s2 + $0x20] sm:$0xff] (!%p1118_p13) }
  0x4a   : > { %1182 = vmatprep.subr.bf16.mxu0 %v1386_v24  ;;  %1297 = vmatprep.subr.bf16.mxu1 %v1386_v24 }
  0x4d   : > { %1183 = vmatpush3.bf16.msra.mxu0 %v1386_v24  ;;  %1305 = vmatpush3.bf16.msra.mxu1 %v1386_v24  ;;  %v735_v24 = vld [vmem:[%s1752_s2 + $0x28] sm:$0xff] (!%p1118_p13) }
  0x4e   : > { %1184 = vmatprep.subr.bf16.mxu0 %v1387_v25  ;;  %1298 = vmatprep.subr.bf16.mxu1 %v1387_v25 }
  0x51   : > { %1185 = vmatpush3.bf16.msra.mxu0 %v1387_v25  ;;  %1306 = vmatpush3.bf16.msra.mxu1 %v1387_v25  ;;  %v1268_v25 = vpack.c.bf16 (!%p1118_p13), %v735_v24, %v734_v23 }
  0x52   : > { %1186 = vmatprep.subr.bf16.mxu0 %v1388_v26  ;;  %1299 = vmatprep.subr.bf16.mxu1 %v1388_v26 }
  0x55   : > { %1187 = vmatpush3.bf16.msra.mxu0 %v1388_v26  ;;  %1307 = vmatpush3.bf16.msra.mxu1 %v1388_v26 }
  0x56   : > { %1261 = vmatprep.subr.bf16.mxu0 (!%p1118_p13), %v1260_v20  ;;  %1308 = vmatprep.subr.bf16.mxu1 (!%p1118_p13), %v1260_v20 }
  0x58   : > { %1189 = vmatmul.mubr.bf16.vlgmr.msra.gmra.mrb[0].mxu0 %v1391_v27  ;;  %1197 = vmatmul.mubr.bf16.vlgmr.msra.gmra.mrb[0].mxu1 %v1392_v28  ;;  %v736_v28 = vld [vmem:[%s1752_s2 + $0x30] sm:$0xff] (!%p1118_p13) }
  0x59   : > { %1192 = vmatprep.mubr.bf16.mxu0 %v1393_v29  ;;  %1200 = vmatprep.mubr.bf16.mxu1 %v1394_v30  ;;  %v737_v29 = vld [vmem:[%s1752_s2 + $0x38] sm:$0xff] (!%p1118_p13) }
  0x5a   : > { %1263 = vmatpush3.bf16.msra.mxu0 (!%p1118_p13), %v1260_v20  ;;  %1316 = vmatpush3.bf16.msra.mxu1 (!%p1118_p13), %v1260_v20  ;;  %v1272_v30 = vpack.c.bf16 (!%p1118_p13), %v737_v29, %v736_v28  ;;  %v759_v28 = vld [vmem:[%s1580_s17 + $0x68] sm:$0xff] (!%p1118_p13) }
  0x5b   : > { %1265 = vmatprep.subr.bf16.mxu0 (!%p1118_p13), %v1264_v22  ;;  %1309 = vmatprep.subr.bf16.mxu1 (!%p1118_p13), %v1264_v22 }
  0x5e   : > { %1267 = vmatpush3.bf16.msra.mxu0 (!%p1118_p13), %v1264_v22  ;;  %1317 = vmatpush3.bf16.msra.mxu1 (!%p1118_p13), %v1264_v22 }
  0x5f   : > { %1269 = vmatprep.subr.bf16.mxu0 (!%p1118_p13), %v1268_v25  ;;  %1310 = vmatprep.subr.bf16.mxu1 (!%p1118_p13), %v1268_v25 }
  0x60   : > { %1193 = vmatmul.mubr.bf16.gmra.mrb[4].mxu0 %v1395_v31  ;;  %1201 = vmatmul.mubr.bf16.gmra.mrb[4].mxu1 %v1396_v32  ;;  %v738_v31 = vld [vmem:[%s1752_s2 + $0x40] sm:$0xff] (!%p1118_p13)  ;;  %v739_v32 = vld [vmem:[%s1752_s2 + $0x48] sm:$0xff] (!%p1118_p13) }
  0x62   : > { %1271 = vmatpush3.bf16.msra.mxu0 (!%p1118_p13), %v1268_v25  ;;  %1318 = vmatpush3.bf16.msra.mxu1 (!%p1118_p13), %v1268_v25 }
  0x63   : > { %1273 = vmatprep.subr.bf16.mxu0 (!%p1118_p13), %v1272_v30  ;;  %1311 = vmatprep.subr.bf16.mxu1 (!%p1118_p13), %v1272_v30 }
  0x66   : > { %1275 = vmatpush3.bf16.msra.mxu0 (!%p1118_p13), %v1272_v30  ;;  %1319 = vmatpush3.bf16.msra.mxu1 (!%p1118_p13), %v1272_v30 }
 0x12b   : > { %v1190_v37 = vpop.f32.mrb[0].mxu0  ;;  %v1198_v38 = vpop.f32.mrb[0].mxu1 }
 0x12c   : > { %v680_v41 = vadd.f32 %v1190_v37, %v439_v33  ;;  %v688_v42 = vadd.f32 %v1198_v38, %v447_v34  ;;  %v615_v43 = vpop.f32.mrb[1].mxu0  ;;  %v647_v44 = vpop.f32.mrb[1].mxu1  ;;  %v1276_v33 = vpack.c.bf16 (!%p1118_p13), %v739_v32, %v738_v31  ;;  %v740_v34 = vld [vmem:[%s1752_s2 + $0x50] sm:$0xff] (!%p1118_p13)  ;;  %v742_v37 = vld [vmem:[%s1752_s2 + $0x60] sm:$0xff] (!%p1118_p13)  ;;  %v743_v38 = vld [vmem:[%s1752_s2 + $0x68] sm:$0xff] (!%p1118_p13) }
 0x12d   : > { %v678_v47 = vadd.f32 %v615_v43, %v437_v35  ;;  %v686_v48 = vadd.f32 %v647_v44, %v445_v36  ;;  %v1191_v49 = vpop.f32.mrb[2].mxu0  ;;  %v1199_v50 = vpop.f32.mrb[2].mxu1  ;;  %v741_v35 = vld [vmem:[%s1752_s2 + $0x58] sm:$0xff] (!%p1118_p13) }
 0x12e   : > { %696 = vst [vmem:[#allocation2 + $0x10] sm:$0xff] %v680_v41  ;;  %704 = vst [vmem:[#allocation2 + $0x50] sm:$0xff] %v688_v42  ;;  %v681_v51 = vadd.f32 %v1191_v49, %v440_v39  ;;  %v689_v52 = vadd.f32 %v1199_v50, %v448_v40  ;;  %v618_v53 = vpop.f32.mrb[3].mxu0  ;;  %v650_v54 = vpop.f32.mrb[3].mxu1  ;;  %1277 = vmatprep.subr.bf16.mxu0 (!%p1118_p13), %v1276_v33  ;;  %1312 = vmatprep.subr.bf16.mxu1 (!%p1118_p13), %v1276_v33  ;;  %v744_v40 = vld [vmem:[%s1752_s2 + $0x70] sm:$0xff] (!%p1118_p13)  ;;  %v745_v41 = vld [vmem:[%s1752_s2 + $0x78] sm:$0xff] (!%p1118_p13) }
 0x12f   : > { %694 = vst [vmem:[#allocation2] sm:$0xff] %v678_v47  ;;  %702 = vst [vmem:[#allocation2 + $0x40] sm:$0xff] %v686_v48  ;;  %v679_v55 = vadd.f32 %v618_v53, %v438_v45  ;;  %v687_v56 = vadd.f32 %v650_v54, %v446_v46  ;;  %v1280_v36 = vpack.c.bf16 (!%p1118_p13), %v741_v35, %v740_v34  ;;  %1279 = vmatpush3.bf16.msra.mxu0 (!%p1118_p13), %v1276_v33  ;;  %v758_v34 = vld [vmem:[%s1580_s17 + $0x60] sm:$0xff] (!%p1118_p13) }
 0x130   : > { %697 = vst [vmem:[#allocation2 + $0x18] sm:$0xff] %v681_v51  ;;  %705 = vst [vmem:[#allocation2 + $0x58] sm:$0xff] %v689_v52  ;;  %1320 = vmatpush3.bf16.msra.mxu1 (!%p1118_p13), %v1276_v33  ;;  %v1284_v39 = vpack.c.bf16 (!%p1118_p13), %v743_v38, %v742_v37  ;;  %v1288_v42 = vpack.c.bf16 (!%p1118_p13), %v745_v41, %v744_v40  ;;  %v750_v33 = vld [vmem:[%s1580_s17 + $0x20] sm:$0xff] (!%p1118_p13) }
 0x131   : > { %695 = vst [vmem:[#allocation2 + $0x8] sm:$0xff] %v679_v55  ;;  %703 = vst [vmem:[#allocation2 + $0x48] sm:$0xff] %v687_v56  ;;  %1281 = vmatprep.subr.bf16.mxu0 (!%p1118_p13), %v1280_v36  ;;  %1313 = vmatprep.subr.bf16.mxu1 (!%p1118_p13), %v1280_v36 }
 0x133   : > { %v1194_v61 = vpop.f32.mrb[4].mxu0  ;;  %v1202_v62 = vpop.f32.mrb[4].mxu1  ;;  %713 = sbr.rel (%p1118_p13) target bundleno = 553 (0x229), region = 93  ;;  %1283 = vmatpush3.bf16.msra.mxu0 (!%p1118_p13), %v1280_v36 }
 0x134   : > { %v684_v1 = vadd.f32 %v1194_v61, %v443_v57  ;;  %v692_v2 = vadd.f32 %v1202_v62, %v451_v58  ;;  %v631_v3 = vpop.f32.mrb[5].mxu0  ;;  %v663_v4 = vpop.f32.mrb[5].mxu1  ;;  %1321 = vmatpush3.bf16.msra.mxu1 (!%p1118_p13), %v1280_v36  ;;  %1285 = vmatprep.subr.bf16.mxu0 (!%p1118_p13), %v1284_v39  ;;  %v747_v57 = vld [vmem:[%s1580_s17 + $0x8] sm:$0xff] (!%p1118_p13)  ;;  %v1662_v62 = vld [vmem:[%s1754_s4] ss:$0 sm:$0xff] (!%p1118_p13) }
 0x135   : > { %v682_v7 = vadd.f32 %v631_v3, %v441_v59  ;;  %v690_v8 = vadd.f32 %v663_v4, %v449_v60  ;;  %v1195_v9 = vpop.f32.mrb[6].mxu0  ;;  %v1203_v10 = vpop.f32.mrb[6].mxu1  ;;  %1314 = vmatprep.subr.bf16.mxu1 (!%p1118_p13), %v1284_v39  ;;  %v716_v45 = vld [vmem:[#allocation2 + $0x10] sm:$0xff] (!%p1118_p13)  ;;  %v755_v58 = vld [vmem:[%s1580_s17 + $0x48] sm:$0xff] (!%p1118_p13)  ;;  %v746_v59 = vld [vmem:[%s1580_s17] sm:$0xff] (!%p1118_p13) }
 0x136   : > { %700 = vst [vmem:[#allocation2 + $0x30] sm:$0xff] %v684_v1  ;;  %708 = vst [vmem:[#allocation2 + $0x70] sm:$0xff] %v692_v2  ;;  %v685_v11 = vadd.f32 %v1195_v9, %v444_v63  ;;  %v693_v12 = vadd.f32 %v1203_v10, %v452_v0  ;;  %v634_v13 = vpop.f32.mrb[7].mxu0  ;;  %v666_v14 = vpop.f32.mrb[7].mxu1  ;;  %v714_v26 = vld [vmem:[#allocation2] sm:$0xff] (!%p1118_p13)  ;;  %v724_v46 = vld [vmem:[#allocation2 + $0x50] sm:$0xff] (!%p1118_p13) }
 0x137   : > { %698 = vst [vmem:[#allocation2 + $0x20] sm:$0xff] %v682_v7  ;;  %706 = vst [vmem:[#allocation2 + $0x60] sm:$0xff] %v690_v8  ;;  %v683_v15 = vadd.f32 %v634_v13, %v442_v5  ;;  %v691_v16 = vadd.f32 %v666_v14, %v450_v6  ;;  %v722_v27 = vld [vmem:[#allocation2 + $0x40] sm:$0xff] (!%p1118_p13)  ;;  %1236 = vmatprep.mubr.f32.mxu0 (!%p1118_p13), %v714_v26  ;;  %1287 = vmatpush3.bf16.msra.mxu0 (!%p1118_p13), %v1284_v39  ;;  %v717_v47 = vld [vmem:[#allocation2 + $0x18] sm:$0xff] (!%p1118_p13) }
 0x138   : > { %701 = vst [vmem:[#allocation2 + $0x38] sm:$0xff] %v685_v11  ;;  %709 = vst [vmem:[#allocation2 + $0x78] sm:$0xff] %v693_v12  ;;  %1248 = vmatprep.mubr.f32.mxu1 (!%p1118_p13), %v722_v27  ;;  %1322 = vmatpush3.bf16.msra.mxu1 (!%p1118_p13), %v1284_v39  ;;  %v715_v43 = vld [vmem:[#allocation2 + $0x8] sm:$0xff] (!%p1118_p13)  ;;  %v725_v48 = vld [vmem:[#allocation2 + $0x58] sm:$0xff] (!%p1118_p13) }
 0x139   : > { %699 = vst [vmem:[#allocation2 + $0x28] sm:$0xff] %v683_v15  ;;  %707 = vst [vmem:[#allocation2 + $0x68] sm:$0xff] %v691_v16  ;;  %1289 = vmatprep.subr.bf16.mxu0 (!%p1118_p13), %v1288_v42  ;;  %1315 = vmatprep.subr.bf16.mxu1 (!%p1118_p13), %v1288_v42  ;;  %v723_v44 = vld [vmem:[#allocation2 + $0x48] sm:$0xff] (!%p1118_p13)  ;;  %v754_v60 = vld [vmem:[%s1580_s17 + $0x40] sm:$0xff] (!%p1118_p13) }
 0x13a   : > { %v1667_v4 = vld [vmem:[%s1755_s5] ss:$0 sm:$0xff]  ;;  %v749_v7 = vld [vmem:[%s1580_s17 + $0x18] sm:$0xff]  ;;  %v748_v11 = vld [vmem:[%s1580_s17 + $0x10] sm:$0xff] }
 0x13b   : > { %1291 = vmatpush3.bf16.msra.mxu0 %v1288_v42  ;;  %v757_v8 = vld [vmem:[%s1580_s17 + $0x58] sm:$0xff]  ;;  %v756_v12 = vld [vmem:[%s1580_s17 + $0x50] sm:$0xff]  ;;  %v751_v27 = vld [vmem:[%s1580_s17 + $0x28] sm:$0xff] }
 0x13c   : > { %1323 = vmatpush3.bf16.msra.mxu1 %v1288_v42 }
 0x13d   : > { %v720_v53 = vld [vmem:[#allocation2 + $0x30] sm:$0xff] }
 0x13e   : > { %1237 = vmatmul.mubr.f32.vlgmr.msra.gmra.mrb[0].mxu0 %v715_v43  ;;  %v718_v49 = vld [vmem:[#allocation2 + $0x20] sm:$0xff]  ;;  %v728_v54 = vld [vmem:[#allocation2 + $0x70] sm:$0xff] }
 0x13f   : > { %1249 = vmatmul.mubr.f32.vlgmr.msra.gmra.mrb[0].mxu1 %v723_v44  ;;  %1239 = vmatprep.mubr.f32.mxu0 %v716_v45  ;;  %v726_v50 = vld [vmem:[#allocation2 + $0x60] sm:$0xff]  ;;  %v721_v55 = vld [vmem:[#allocation2 + $0x38] sm:$0xff] }
 0x140   : > { %1251 = vmatprep.mubr.f32.mxu1 %v724_v46  ;;  %v719_v51 = vld [vmem:[#allocation2 + $0x28] sm:$0xff]  ;;  %v729_v56 = vld [vmem:[#allocation2 + $0x78] sm:$0xff] }
 0x141   : > { %v727_v52 = vld [vmem:[#allocation2 + $0x68] sm:$0xff] }
 0x142   : > { %1240 = vmatmul.mubr.f32.gmra.mrb[2].mxu0 %v717_v47 }
 0x143   : > { %1252 = vmatmul.mubr.f32.gmra.mrb[2].mxu1 %v725_v48  ;;  %1242 = vmatprep.mubr.f32.mxu0 %v718_v49 }
 0x144   : > { %1254 = vmatprep.mubr.f32.mxu1 %v726_v50 }
 0x146   : > { %1243 = vmatmul.mubr.f32.gmra.mrb[4].mxu0 %v719_v51  ;;  %v753_v51 = vld [vmem:[%s1580_s17 + $0x38] sm:$0xff] }
 0x147   : > { %1255 = vmatmul.mubr.f32.gmra.mrb[4].mxu1 %v727_v52  ;;  %1245 = vmatprep.mubr.f32.mxu0 %v720_v53  ;;  %v761_v52 = vld [vmem:[%s1580_s17 + $0x78] sm:$0xff] }
 0x148   : > { %1257 = vmatprep.mubr.f32.mxu1 %v728_v54 }
 0x14a   : > { %1246 = vmatmul.mubr.f32.gmra.mrb[6].mxu0 %v721_v55 }
 0x14b   : > { %1258 = vmatmul.mubr.f32.gmra.mrb[6].mxu1 %v729_v56 }
 0x211   : > { %v1238_v61 = vpop.f32.mrb[0].mxu0 }
 0x212   : > { %v1250_v63 = vpop.f32.mrb[0].mxu1  ;;  %v834_v0 = vadd.f32 %v1238_v61, %v747_v57  ;;  %v828_v2 = vpop.f32.mrb[1].mxu0  ;;  %v752_v57 = vld [vmem:[%s1580_s17 + $0x30] sm:$0xff] }
 0x213   : > { %v874_v1 = vadd.f32 %v1250_v63, %v755_v58  ;;  %v868_v3 = vpop.f32.mrb[1].mxu1  ;;  %v829_v5 = vadd.f32 %v828_v2, %v746_v59  ;;  %v760_v58 = vld [vmem:[%s1580_s17 + $0x70] sm:$0xff] }
 0x214   : > { %v869_v6 = vadd.f32 %v868_v3, %v754_v60  ;;  %v915_v9 = vmul.f32 %v1662_v62, %v834_v0 }
 0x215   : > { %v923_v10 = vmul.f32 %v1662_v62, %v874_v1  ;;  %v914_v13 = vmul.f32 %v1662_v62, %v829_v5  ;;  %v1241_v15 = vpop.f32.mrb[2].mxu0 }
 0x216   : > { %v922_v14 = vmul.f32 %v1662_v62, %v869_v6  ;;  %v1253_v16 = vpop.f32.mrb[2].mxu1  ;;  %v938_v17 = vadd.f32 %v1667_v4, %v915_v9  ;;  %v844_v19 = vadd.f32 %v1241_v15, %v749_v7  ;;  %v838_v21 = vpop.f32.mrb[3].mxu0 }
 0x217   : > { %v946_v18 = vadd.f32 %v1667_v4, %v923_v10  ;;  %v884_v20 = vadd.f32 %v1253_v16, %v757_v8  ;;  %v878_v22 = vpop.f32.mrb[3].mxu1  ;;  %v937_v23 = vadd.f32 %v1667_v4, %v914_v13  ;;  %v839_v25 = vadd.f32 %v838_v21, %v748_v11 }
 0x218   : > { %v945_v24 = vadd.f32 %v1667_v4, %v922_v14  ;;  %v879_v26 = vadd.f32 %v878_v22, %v756_v12  ;;  %v954_v29 = vmax.f32 %v938_v17, 0.0  ;;  %v917_v31 = vmul.f32 %v1662_v62, %v844_v19 }
 0x219   : > { %v962_v30 = vmax.f32 %v946_v18, 0.0  ;;  %v925_v32 = vmul.f32 %v1662_v62, %v884_v20  ;;  %v953_v35 = vmax.f32 %v937_v23, 0.0  ;;  %v916_v37 = vmul.f32 %v1662_v62, %v839_v25  ;;  %v1244_v39 = vpop.f32.mrb[4].mxu0 }
 0x21a   : > { %v961_v36 = vmax.f32 %v945_v24, 0.0  ;;  %v924_v38 = vmul.f32 %v1662_v62, %v879_v26  ;;  %v1256_v40 = vpop.f32.mrb[4].mxu1  ;;  %970 = vst [vmem:[%s1585_s19 + $0x8] sm:$0xff] %v954_v29  ;;  %v940_v41 = vadd.f32 %v1667_v4, %v917_v31  ;;  %v854_v43 = vadd.f32 %v1244_v39, %v751_v27  ;;  %v848_v45 = vpop.f32.mrb[5].mxu0 }
 0x21b   : > { %978 = vst [vmem:[%s1585_s19 + $0x48] sm:$0xff] %v962_v30  ;;  %v948_v42 = vadd.f32 %v1667_v4, %v925_v32  ;;  %v894_v44 = vadd.f32 %v1256_v40, %v759_v28  ;;  %v888_v46 = vpop.f32.mrb[5].mxu1  ;;  %969 = vst [vmem:[%s1585_s19] sm:$0xff] %v953_v35  ;;  %v939_v47 = vadd.f32 %v1667_v4, %v916_v37 }
 0x21c   : > { %977 = vst [vmem:[%s1585_s19 + $0x40] sm:$0xff] %v961_v36  ;;  %v947_v48 = vadd.f32 %v1667_v4, %v924_v38  ;;  %v849_v49 = vadd.f32 %v848_v45, %v750_v33  ;;  %v889_v50 = vadd.f32 %v888_v46, %v758_v34  ;;  %v956_v53 = vmax.f32 %v940_v41, 0.0 }
 0x21d   : > { %v964_v54 = vmax.f32 %v948_v42, 0.0  ;;  %v919_v55 = vmul.f32 %v1662_v62, %v854_v43  ;;  %v927_v56 = vmul.f32 %v1662_v62, %v894_v44  ;;  %v955_v59 = vmax.f32 %v939_v47, 0.0  ;;  %v1247_v0 = vpop.f32.mrb[6].mxu0 }
 0x21e   : > { %v963_v60 = vmax.f32 %v947_v48, 0.0  ;;  %v918_v61 = vmul.f32 %v1662_v62, %v849_v49  ;;  %v926_v63 = vmul.f32 %v1662_v62, %v889_v50  ;;  %v1259_v1 = vpop.f32.mrb[6].mxu1  ;;  %972 = vst [vmem:[%s1585_s19 + $0x18] sm:$0xff] %v956_v53  ;;  %v864_v5 = vadd.f32 %v1247_v0, %v753_v51  ;;  %v858_v7 = vpop.f32.mrb[7].mxu0 }
 0x21f   : > { %980 = vst [vmem:[%s1585_s19 + $0x58] sm:$0xff] %v964_v54  ;;  %v942_v2 = vadd.f32 %v1667_v4, %v919_v55  ;;  %v950_v3 = vadd.f32 %v1667_v4, %v927_v56  ;;  %v904_v6 = vadd.f32 %v1259_v1, %v761_v52  ;;  %v898_v8 = vpop.f32.mrb[7].mxu1  ;;  %971 = vst [vmem:[%s1585_s19 + $0x10] sm:$0xff] %v955_v59 }
 0x220   : > { %979 = vst [vmem:[%s1585_s19 + $0x50] sm:$0xff] %v963_v60  ;;  %v941_v9 = vadd.f32 %v1667_v4, %v918_v61  ;;  %v949_v10 = vadd.f32 %v1667_v4, %v926_v63  ;;  %v859_v11 = vadd.f32 %v858_v7, %v752_v57  ;;  %v899_v12 = vadd.f32 %v898_v8, %v760_v58 }
 0x221   : > { %v958_v13 = vmax.f32 %v942_v2, 0.0  ;;  %v966_v14 = vmax.f32 %v950_v3, 0.0  ;;  %v921_v15 = vmul.f32 %v1662_v62, %v864_v5  ;;  %v929_v16 = vmul.f32 %v1662_v62, %v904_v6 }
 0x222   : > { %v957_v17 = vmax.f32 %v941_v9, 0.0  ;;  %v965_v18 = vmax.f32 %v949_v10, 0.0  ;;  %v920_v19 = vmul.f32 %v1662_v62, %v859_v11  ;;  %v928_v20 = vmul.f32 %v1662_v62, %v899_v12 }
 0x223   : > { %974 = vst [vmem:[%s1585_s19 + $0x28] sm:$0xff] %v958_v13  ;;  %982 = vst [vmem:[%s1585_s19 + $0x68] sm:$0xff] %v966_v14  ;;  %v944_v21 = vadd.f32 %v1667_v4, %v921_v15  ;;  %v952_v22 = vadd.f32 %v1667_v4, %v929_v16 }
 0x224   : > { %973 = vst [vmem:[%s1585_s19 + $0x20] sm:$0xff] %v957_v17  ;;  %981 = vst [vmem:[%s1585_s19 + $0x60] sm:$0xff] %v965_v18  ;;  %v943_v23 = vadd.f32 %v1667_v4, %v920_v19  ;;  %v951_v24 = vadd.f32 %v1667_v4, %v928_v20 }
 0x225   : > { %v960_v25 = vmax.f32 %v944_v21, 0.0  ;;  %v968_v26 = vmax.f32 %v952_v22, 0.0 }
 0x226   : > { %v959_v27 = vmax.f32 %v943_v23, 0.0  ;;  %v967_v28 = vmax.f32 %v951_v24, 0.0 }
 0x227   : > { %976 = vst [vmem:[%s1585_s19 + $0x38] sm:$0xff] %v960_v25  ;;  %984 = vst [vmem:[%s1585_s19 + $0x78] sm:$0xff] %v968_v26 }
 0x228   : > { %975 = vst [vmem:[%s1585_s19 + $0x30] sm:$0xff] %v959_v27  ;;  %983 = vst [vmem:[%s1585_s19 + $0x70] sm:$0xff] %v967_v28 }
 0x229 PF: > { %s16_s27 = sadd.s32 1, %s1451_s27   ;;  %s1757_s21 = smov %s1431_s22 }
 0x22a   : > { %p13_p0 = scmp.ge.s32.totalorder %s16_s27, 6   ;;  %s1758_s22 = smov %s1540_s10 }
 0x22b   : > { %s1759_s23 = smov %s1443_s25  ;;  %s1760_s24 = smov %s1447_s26 }
 0x22c   : > { %s1761_s25 = smov %s1764_s28  ;;  %s1762_s26 = smov %s1768_s29 }
 0x22d   :  { %15 = sbr.rel (!%p13_p0) target bundleno = 4 (0x4), region = 134 }

// kernel: sage_forward.6
= control target key start
LH: loop header
LB: loop body
LE: loop exit
PB: predicated region body
PF: predicated region fallthrough
CT: control target
= control target key end

     0   :  { %s1152_s18 = smov 0   ;;  %s1343_s0 = inlined_call_operand.vmem [shape: f32[256,128], index: 0, kind: input, shape index: {}]   ;;  %s1344_s1 = inlined_call_operand.vmem [shape: f32[128,128], index: 1, kind: input, shape index: {}]   ;;  %s1345_s2 = inlined_call_operand.vmem [shape: f32[1,128], index: 2, kind: input, shape index: {}]   ;;  %s1346_s3 = inlined_call_operand.vmem [shape: f32[128,128], index: 3, kind: input, shape index: {}]   ;;  %s1347_s4 = inlined_call_operand.vmem [shape: f32[256,128], index: 4, kind: output, shape index: {0}]   ;;  %s1348_s5 = inlined_call_operand.vmem [shape: bf16[256,128], index: 5, kind: output, shape index: {1}]  }
   0x1 LB: > { %s773_s19 = sadd.s32 4294967295, %s1120_s18   ;;  %p777_p0 = scmp.ge.s32.totalorder %s1120_s18, 1  ;;  %s1120_s18 = sphi %s1152_s18, %s16_s18  }
   0x2   : > { %p191_p1 = scmp.lt.s32.totalorder %s1120_s18, 3 }
   0x4   : > { %p192_p2 = pnand %p777_p0, %p191_p1 }
   0x5   : > { %v258_v0 = vld [vmem:[%s1344_s1] sm:$0xff] (!%p192_p2)  ;;  %v259_v1 = vld [vmem:[%s1344_s1 + $0x8] sm:$0xff] (!%p192_p2)  ;;  %s778_s26 = sshll.u32 (!%p192_p2), %s773_s19, 4  ;;  %v260_v5 = vld [vmem:[%s1344_s1 + $0x10] sm:$0xff] (!%p192_p2) }
   0x6   : > { %195 = sbr.rel (%p192_p2) target bundleno = 285 (0x11d), region = 36  ;;  %v442_v2 = vld [vmem:[%s1346_s3] sm:$0xff] (!%p192_p2)  ;;  %v1042_v3 = vpack.c.bf16 (!%p192_p2), %v259_v1, %v258_v0  ;;  %v443_v4 = vld [vmem:[%s1346_s3 + $0x8] sm:$0xff] (!%p192_p2)  ;;  %v261_v6 = vld [vmem:[%s1344_s1 + $0x18] sm:$0xff] (!%p192_p2)  ;;  %p225_p3 = scmp.lt.s32.totalorder (!%p192_p2), %s778_s26, 31 }
   0x7   : > { %v1074_v7 = vpack.c.bf16 (!%p192_p2), %v443_v4, %v442_v2  ;;  %v1046_v8 = vpack.c.bf16 (!%p192_p2), %v261_v6, %v260_v5  ;;  %v444_v9 = vld [vmem:[%s1346_s3 + $0x10] sm:$0xff] (!%p192_p2)  ;;  %v445_v10 = vld [vmem:[%s1346_s3 + $0x18] sm:$0xff] (!%p192_p2)  ;;  %v262_v11 = vld [vmem:[%s1344_s1 + $0x20] sm:$0xff] (!%p192_p2) }
   0x8   : > { %1043 = vmatprep.subr.bf16.mxu0 (!%p192_p2), %v1042_v3  ;;  %v1078_v12 = vpack.c.bf16 (!%p192_p2), %v445_v10, %v444_v9  ;;  %v263_v13 = vld [vmem:[%s1344_s1 + $0x28] sm:$0xff] (!%p192_p2)  ;;  %v446_v14 = vld [vmem:[%s1346_s3 + $0x20] sm:$0xff] (!%p192_p2)  ;;  %v264_v18 = vld [vmem:[%s1344_s1 + $0x30] sm:$0xff] (!%p192_p2) }
   0x9   : > { %v447_v15 = vld [vmem:[%s1346_s3 + $0x28] sm:$0xff] (!%p192_p2)  ;;  %1075 = vmatprep.subr.bf16.mxu1 (!%p192_p2), %v1074_v7  ;;  %1045 = vmatpush3.bf16.msra.mxu0 (!%p192_p2), %v1042_v3  ;;  %v1050_v16 = vpack.c.bf16 (!%p192_p2), %v263_v13, %v262_v11  ;;  %v265_v19 = vld [vmem:[%s1344_s1 + $0x38] sm:$0xff] (!%p192_p2)  ;;  %v448_v20 = vld [vmem:[%s1346_s3 + $0x30] sm:$0xff] (!%p192_p2) }
   0xa   : > { %1077 = vmatpush3.bf16.msra.mxu1 (!%p192_p2), %v1074_v7  ;;  %1047 = vmatprep.subr.bf16.mxu0 (!%p192_p2), %v1046_v8  ;;  %v1082_v17 = vpack.c.bf16 (!%p192_p2), %v447_v15, %v446_v14  ;;  %v449_v21 = vld [vmem:[%s1346_s3 + $0x38] sm:$0xff] (!%p192_p2)  ;;  %v1054_v22 = vpack.c.bf16 (!%p192_p2), %v265_v19, %v264_v18  ;;  %v266_v24 = vld [vmem:[%s1344_s1 + $0x40] sm:$0xff] (!%p192_p2)  ;;  %v267_v25 = vld [vmem:[%s1344_s1 + $0x48] sm:$0xff] (!%p192_p2) }
   0xb   : > { %1079 = vmatprep.subr.bf16.mxu1 (!%p192_p2), %v1078_v12  ;;  %v1086_v23 = vpack.c.bf16 (!%p192_p2), %v449_v21, %v448_v20  ;;  %v450_v27 = vld [vmem:[%s1346_s3 + $0x40] sm:$0xff] (!%p192_p2)  ;;  %v451_v28 = vld [vmem:[%s1346_s3 + $0x48] sm:$0xff] (!%p192_p2)  ;;  %v1058_v29 = vpack.c.bf16 (!%p192_p2), %v267_v25, %v266_v24  ;;  %v268_v31 = vld [vmem:[%s1344_s1 + $0x50] sm:$0xff] (!%p192_p2) }
   0xc   : > { %v1090_v30 = vpack.c.bf16 (!%p192_p2), %v451_v28, %v450_v27  ;;  %v269_v32 = vld [vmem:[%s1344_s1 + $0x58] sm:$0xff] (!%p192_p2)  ;;  %v452_v33 = vld [vmem:[%s1346_s3 + $0x50] sm:$0xff] (!%p192_p2)  ;;  %v270_v37 = vld [vmem:[%s1344_s1 + $0x60] sm:$0xff] (!%p192_p2) }
   0xd   : > { %s1350_s26 = smov (!%p225_p3, %s778_s26), 31  ;;  %1049 = vmatpush3.bf16.msra.mxu0 %v1046_v8  ;;  %v453_v34 = vld [vmem:[%s1346_s3 + $0x58] sm:$0xff]  ;;  %v1062_v35 = vpack.c.bf16 %v269_v32, %v268_v31  ;;  %v271_v38 = vld [vmem:[%s1344_s1 + $0x68] sm:$0xff]  ;;  %v454_v39 = vld [vmem:[%s1346_s3 + $0x60] sm:$0xff] }
   0xe   : > { %s779_s21 = sshll.u32 %s1350_s26, 3  ;;  %1081 = vmatpush3.bf16.msra.mxu1 %v1078_v12  ;;  %1051 = vmatprep.subr.bf16.mxu0 %v1050_v16  ;;  %v1094_v36 = vpack.c.bf16 %v453_v34, %v452_v33  ;;  %v455_v40 = vld [vmem:[%s1346_s3 + $0x68] sm:$0xff]  ;;  %v1066_v41 = vpack.c.bf16 %v271_v38, %v270_v37  ;;  %v272_v43 = vld [vmem:[%s1344_s1 + $0x70] sm:$0xff]  ;;  %v273_v44 = vld [vmem:[%s1344_s1 + $0x78] sm:$0xff]  ;;  %s783_s24 = sshll.u32 %s1350_s26, 2 }
   0xf   : > { %s1216_s8 = scalar_lea.vmem %s1343_s0, %s779_s21  ;;  %1083 = vmatprep.subr.bf16.mxu1 %v1082_v17  ;;  %v1098_v42 = vpack.c.bf16 %v455_v40, %v454_v39  ;;  %v456_v45 = vld [vmem:[%s1346_s3 + $0x70] sm:$0xff]  ;;  %v457_v46 = vld [vmem:[%s1346_s3 + $0x78] sm:$0xff]  ;;  %v1070_v47 = vpack.c.bf16 %v273_v44, %v272_v43  ;;  %v1285_v0 = vld [vmem:[%s1345_s2] ss:$0 sm:$0xff]  ;;  %s1293_s28 = scalar_lea.vmem %s1347_s4, %s779_s21 }
  0x10   : > { %v242_v26 = vld [vmem:[%s1216_s8] sm:$0xff]  ;;  %v1102_v48 = vpack.c.bf16 %v457_v46, %v456_v45  ;;  %v243_v49 = vld [vmem:[%s1216_s8 + $0x8] sm:$0xff]  ;;  %v244_v50 = vld [vmem:[%s1216_s8 + $0x10] sm:$0xff]  ;;  %s1300_s26 = scalar_lea.vmem %s1348_s5, %s783_s24 }
  0x11   : > { %962 = vmatprep.mubr.f32.mxu0 %v242_v26  ;;  %1018 = vmatprep.mubr.f32.mxu1 %v242_v26  ;;  %v245_v51 = vld [vmem:[%s1216_s8 + $0x18] sm:$0xff]  ;;  %v246_v52 = vld [vmem:[%s1216_s8 + $0x20] sm:$0xff]  ;;  %v247_v53 = vld [vmem:[%s1216_s8 + $0x28] sm:$0xff] }
  0x12   : > { %1053 = vmatpush3.bf16.msra.mxu0 %v1050_v16  ;;  %1085 = vmatpush3.bf16.msra.mxu1 %v1082_v17  ;;  %v248_v54 = vld [vmem:[%s1216_s8 + $0x30] sm:$0xff]  ;;  %v249_v55 = vld [vmem:[%s1216_s8 + $0x38] sm:$0xff]  ;;  %v250_v56 = vld [vmem:[%s1216_s8 + $0x40] sm:$0xff] }
  0x13   : > { %1055 = vmatprep.subr.bf16.mxu0 %v1054_v22  ;;  %1087 = vmatprep.subr.bf16.mxu1 %v1086_v23  ;;  %v251_v57 = vld [vmem:[%s1216_s8 + $0x48] sm:$0xff]  ;;  %v252_v58 = vld [vmem:[%s1216_s8 + $0x50] sm:$0xff]  ;;  %v253_v59 = vld [vmem:[%s1216_s8 + $0x58] sm:$0xff] }
  0x14   : > { %v254_v60 = vld [vmem:[%s1216_s8 + $0x60] sm:$0xff]  ;;  %v255_v61 = vld [vmem:[%s1216_s8 + $0x68] sm:$0xff]  ;;  %v256_v62 = vld [vmem:[%s1216_s8 + $0x70] sm:$0xff] }
  0x15   : > { %v257_v63 = vld [vmem:[%s1216_s8 + $0x78] sm:$0xff] }
  0x16   : > { %1057 = vmatpush3.bf16.msra.mxu0 %v1054_v22  ;;  %1089 = vmatpush3.bf16.msra.mxu1 %v1086_v23 }
  0x17   : > { %1059 = vmatprep.subr.bf16.mxu0 %v1058_v29  ;;  %1091 = vmatprep.subr.bf16.mxu1 %v1090_v30 }
  0x1a   : > { %1061 = vmatpush3.bf16.msra.mxu0 %v1058_v29  ;;  %1093 = vmatpush3.bf16.msra.mxu1 %v1090_v30 }
  0x1b   : > { %1063 = vmatprep.subr.bf16.mxu0 %v1062_v35  ;;  %1095 = vmatprep.subr.bf16.mxu1 %v1094_v36 }
  0x1e   : > { %1065 = vmatpush3.bf16.msra.mxu0 %v1062_v35  ;;  %1097 = vmatpush3.bf16.msra.mxu1 %v1094_v36 }
  0x1f   : > { %1067 = vmatprep.subr.bf16.mxu0 %v1066_v41  ;;  %1099 = vmatprep.subr.bf16.mxu1 %v1098_v42 }
  0x22   : > { %1069 = vmatpush3.bf16.msra.mxu0 %v1066_v41  ;;  %1101 = vmatpush3.bf16.msra.mxu1 %v1098_v42 }
  0x23   : > { %1071 = vmatprep.subr.bf16.mxu0 %v1070_v47  ;;  %1103 = vmatprep.subr.bf16.mxu1 %v1102_v48 }
  0x26   : > { %1073 = vmatpush3.bf16.msra.mxu0 %v1070_v47  ;;  %1105 = vmatpush3.bf16.msra.mxu1 %v1102_v48 }
  0x29   : > { %963 = vmatmul.mubr.f32.vlgmr.msra.gmra.mrb[0].mxu0 %v243_v49  ;;  %1019 = vmatmul.mubr.f32.vlgmr.msra.gmra.mrb[0].mxu1 %v243_v49 }
  0x2a   : > { %965 = vmatprep.mubr.f32.mxu0 %v244_v50  ;;  %1021 = vmatprep.mubr.f32.mxu1 %v244_v50 }
  0x2d   : > { %966 = vmatmul.mubr.f32.gmra.mrb[2].mxu0 %v245_v51  ;;  %1022 = vmatmul.mubr.f32.gmra.mrb[2].mxu1 %v245_v51 }
  0x2e   : > { %968 = vmatprep.mubr.f32.mxu0 %v246_v52  ;;  %1024 = vmatprep.mubr.f32.mxu1 %v246_v52 }
  0x31   : > { %969 = vmatmul.mubr.f32.gmra.mrb[4].mxu0 %v247_v53  ;;  %1025 = vmatmul.mubr.f32.gmra.mrb[4].mxu1 %v247_v53 }
  0x32   : > { %971 = vmatprep.mubr.f32.mxu0 %v248_v54  ;;  %1027 = vmatprep.mubr.f32.mxu1 %v248_v54 }
  0x35   : > { %972 = vmatmul.mubr.f32.gmra.mrb[6].mxu0 %v249_v55  ;;  %1028 = vmatmul.mubr.f32.gmra.mrb[6].mxu1 %v249_v55 }
  0x36   : > { %974 = vmatprep.mubr.f32.mxu0 %v250_v56  ;;  %1030 = vmatprep.mubr.f32.mxu1 %v250_v56 }
  0x39   : > { %975 = vmatmul.mubr.f32.gmra.mrb[8].mxu0 %v251_v57  ;;  %1031 = vmatmul.mubr.f32.gmra.mrb[8].mxu1 %v251_v57 }
  0x3a   : > { %977 = vmatprep.mubr.f32.mxu0 %v252_v58  ;;  %1033 = vmatprep.mubr.f32.mxu1 %v252_v58 }
  0x3d   : > { %978 = vmatmul.mubr.f32.gmra.mrb[10].mxu0 %v253_v59  ;;  %1034 = vmatmul.mubr.f32.gmra.mrb[10].mxu1 %v253_v59 }
  0x3e   : > { %980 = vmatprep.mubr.f32.mxu0 %v254_v60  ;;  %1036 = vmatprep.mubr.f32.mxu1 %v254_v60 }
  0x41   : > { %981 = vmatmul.mubr.f32.gmra.mrb[12].mxu0 %v255_v61  ;;  %1037 = vmatmul.mubr.f32.gmra.mrb[12].mxu1 %v255_v61 }
  0x42   : > { %983 = vmatprep.mubr.f32.mxu0 %v256_v62  ;;  %1039 = vmatprep.mubr.f32.mxu1 %v256_v62 }
  0x45   : > { %984 = vmatmul.mubr.f32.gmra.mrb[14].mxu0 %v257_v63  ;;  %1040 = vmatmul.mubr.f32.gmra.mrb[14].mxu1 %v257_v63 }
  0xfc   : > { %v964_v1 = vpop.f32.mrb[0].mxu0  ;;  %v1020_v3 = vpop.f32.mrb[0].mxu1 }
  0xfd   : > { %v353_v2 = vadd.f32 %v964_v1, %v1285_v0  ;;  %v347_v4 = vpop.f32.mrb[1].mxu0  ;;  %v524_v6 = vpop.f32.mrb[1].mxu1 }
  0xfe   : > { %v348_v5 = vadd.f32 %v1285_v0, %v347_v4  ;;  %v822_v7 = vpack.c.bf16 %v1020_v3, %v524_v6 }
  0xff   : > { %427 = vst [vmem:[%s1293_s28 + $0x8] sm:$0xff] %v353_v2 }
 0x100   : > { %426 = vst [vmem:[%s1293_s28] sm:$0xff] %v348_v5  ;;  %v967_v8 = vpop.f32.mrb[2].mxu0  ;;  %823 = vst [vmem:[%s1300_s26] sm:$0xff] %v822_v7   ;;  %v1023_v10 = vpop.f32.mrb[2].mxu1 }
 0x101   : > { %v363_v9 = vadd.f32 %v967_v8, %v1285_v0  ;;  %v357_v11 = vpop.f32.mrb[3].mxu0  ;;  %v534_v13 = vpop.f32.mrb[3].mxu1 }
 0x102   : > { %v358_v12 = vadd.f32 %v1285_v0, %v357_v11  ;;  %v827_v14 = vpack.c.bf16 %v1023_v10, %v534_v13 }
 0x103   : > { %429 = vst [vmem:[%s1293_s28 + $0x18] sm:$0xff] %v363_v9 }
 0x104   : > { %428 = vst [vmem:[%s1293_s28 + $0x10] sm:$0xff] %v358_v12  ;;  %v970_v15 = vpop.f32.mrb[4].mxu0  ;;  %859 = vst [vmem:[%s1300_s26 + $0x8] sm:$0xff] %v827_v14   ;;  %v1026_v17 = vpop.f32.mrb[4].mxu1 }
 0x105   : > { %v373_v16 = vadd.f32 %v970_v15, %v1285_v0  ;;  %v367_v18 = vpop.f32.mrb[5].mxu0  ;;  %v544_v20 = vpop.f32.mrb[5].mxu1 }
 0x106   : > { %v368_v19 = vadd.f32 %v1285_v0, %v367_v18  ;;  %v832_v21 = vpack.c.bf16 %v1026_v17, %v544_v20 }
 0x107   : > { %431 = vst [vmem:[%s1293_s28 + $0x28] sm:$0xff] %v373_v16 }
 0x108   : > { %430 = vst [vmem:[%s1293_s28 + $0x20] sm:$0xff] %v368_v19  ;;  %v973_v22 = vpop.f32.mrb[6].mxu0  ;;  %860 = vst [vmem:[%s1300_s26 + $0x10] sm:$0xff] %v832_v21   ;;  %v1029_v24 = vpop.f32.mrb[6].mxu1 }
 0x109   : > { %v383_v23 = vadd.f32 %v973_v22, %v1285_v0  ;;  %v377_v25 = vpop.f32.mrb[7].mxu0  ;;  %v554_v27 = vpop.f32.mrb[7].mxu1 }
 0x10a   : > { %v378_v26 = vadd.f32 %v1285_v0, %v377_v25  ;;  %v837_v28 = vpack.c.bf16 %v1029_v24, %v554_v27 }
 0x10b   : > { %433 = vst [vmem:[%s1293_s28 + $0x38] sm:$0xff] %v383_v23 }
 0x10c   : > { %432 = vst [vmem:[%s1293_s28 + $0x30] sm:$0xff] %v378_v26  ;;  %v976_v29 = vpop.f32.mrb[8].mxu0  ;;  %861 = vst [vmem:[%s1300_s26 + $0x18] sm:$0xff] %v837_v28   ;;  %v1032_v31 = vpop.f32.mrb[8].mxu1 }
 0x10d   : > { %v393_v30 = vadd.f32 %v976_v29, %v1285_v0  ;;  %v387_v32 = vpop.f32.mrb[9].mxu0  ;;  %v564_v34 = vpop.f32.mrb[9].mxu1 }
 0x10e   : > { %v388_v33 = vadd.f32 %v1285_v0, %v387_v32  ;;  %v842_v35 = vpack.c.bf16 %v1032_v31, %v564_v34 }
 0x10f   : > { %435 = vst [vmem:[%s1293_s28 + $0x48] sm:$0xff] %v393_v30 }
 0x110   : > { %434 = vst [vmem:[%s1293_s28 + $0x40] sm:$0xff] %v388_v33  ;;  %v979_v36 = vpop.f32.mrb[10].mxu0  ;;  %862 = vst [vmem:[%s1300_s26 + $0x20] sm:$0xff] %v842_v35   ;;  %v1035_v38 = vpop.f32.mrb[10].mxu1 }
 0x111   : > { %v403_v37 = vadd.f32 %v979_v36, %v1285_v0  ;;  %v397_v39 = vpop.f32.mrb[11].mxu0  ;;  %v574_v41 = vpop.f32.mrb[11].mxu1 }
 0x112   : > { %v398_v40 = vadd.f32 %v1285_v0, %v397_v39  ;;  %v847_v42 = vpack.c.bf16 %v1035_v38, %v574_v41 }
 0x113   : > { %437 = vst [vmem:[%s1293_s28 + $0x58] sm:$0xff] %v403_v37 }
 0x114   : > { %436 = vst [vmem:[%s1293_s28 + $0x50] sm:$0xff] %v398_v40  ;;  %v982_v43 = vpop.f32.mrb[12].mxu0  ;;  %863 = vst [vmem:[%s1300_s26 + $0x28] sm:$0xff] %v847_v42   ;;  %v1038_v45 = vpop.f32.mrb[12].mxu1 }
 0x115   : > { %v413_v44 = vadd.f32 %v982_v43, %v1285_v0  ;;  %v407_v46 = vpop.f32.mrb[13].mxu0  ;;  %v584_v48 = vpop.f32.mrb[13].mxu1 }
 0x116   : > { %v408_v47 = vadd.f32 %v1285_v0, %v407_v46  ;;  %v852_v49 = vpack.c.bf16 %v1038_v45, %v584_v48 }
 0x117   : > { %439 = vst [vmem:[%s1293_s28 + $0x68] sm:$0xff] %v413_v44 }
 0x118   : > { %438 = vst [vmem:[%s1293_s28 + $0x60] sm:$0xff] %v408_v47  ;;  %v985_v50 = vpop.f32.mrb[14].mxu0  ;;  %864 = vst [vmem:[%s1300_s26 + $0x30] sm:$0xff] %v852_v49   ;;  %v1041_v52 = vpop.f32.mrb[14].mxu1 }
 0x119   : > { %v423_v51 = vadd.f32 %v985_v50, %v1285_v0  ;;  %v417_v53 = vpop.f32.mrb[15].mxu0  ;;  %v594_v55 = vpop.f32.mrb[15].mxu1 }
 0x11a   : > { %v418_v54 = vadd.f32 %v1285_v0, %v417_v53  ;;  %v857_v56 = vpack.c.bf16 %v1041_v52, %v594_v55 }
 0x11b   : > { %441 = vst [vmem:[%s1293_s28 + $0x78] sm:$0xff] %v423_v51 }
 0x11c   : > { %440 = vst [vmem:[%s1293_s28 + $0x70] sm:$0xff] %v418_v54  ;;  %865 = vst [vmem:[%s1300_s26 + $0x38] sm:$0xff] %v857_v56  }
 0x11d PF: > { %s16_s18 = sadd.s32 1, %s1120_s18  }
 0x11e   : > { %p13_p4 = scmp.ge.s32.totalorder %s16_s18, 4  }
 0x120   :  { %15 = sbr.rel (!%p13_p4) target bundleno = 1 (0x1), region = 78 }

// kernel: sage_forward.7
= control target key start
LH: loop header
LB: loop body
LE: loop exit
PB: predicated region body
PF: predicated region fallthrough
CT: control target
= control target key end

     0   :  { %s2111_s0 = inlined_call_operand.vmem [shape: bf16[256,256], index: 0, kind: input, shape index: {}]   ;;  %s2112_s1 = inlined_call_operand.vmem [shape: bf16[256,128], index: 1, kind: input, shape index: {}]   ;;  %s2113_s2 = inlined_call_operand.vmem [shape: f32[256,128], index: 2, kind: input, shape index: {}]   ;;  %s2114_s3 = inlined_call_operand.vmem [shape: f32[256,128], index: 3, kind: output, shape index: {0}]   ;;  %s2115_s4 = inlined_call_operand.vmem [shape: f32[2,8,128], index: 4, kind: output, shape index: {1}]   ;;  %s2116_s5 = inlined_call_operand.vmem [shape: f32[2,8,128], index: 5, kind: output, shape index: {2}]  }
   0x1   :  { %2117 = sst [smem:[#allocation4_spill]] %s2111_s0 }
   0x2   :  { %2118 = sst [smem:[#allocation5_spill]] %s2112_s1 }
   0x3   :  { %s1628_s18 = smov 0   ;;  %s1630_s19 = smov 0  }
   0x4   :  { %s1632_s20 = smov 0   ;;  %s1634_s21 = smov 0  }
   0x5   :  { %s1636_s22 = smov 0   ;;  %s1638_s23 = smov 0  }
   0x6   :  { %s1640_s24 = smov 0  }
   0x7 LB: > { %s25_s25 = sadd.s32 1, %s1587_s22  ;;  %s28_s26 = sadd.s32 1, %s1591_s23  ;;  %s1595_s24 = sphi %s1640_s24, %s16_s24   ;;  %s1591_s23 = sphi %s1638_s23, %s2127_s23   ;;  %s1587_s22 = sphi %s1636_s22, %s2126_s22   ;;  %s1583_s21 = sphi %s1634_s21, %s2125_s21   ;;  %s1579_s20 = sphi %s1632_s20, %s2124_s20   ;;  %s1575_s19 = sphi %s1630_s19, %s2123_s19   ;;  %s1571_s18 = sphi %s1628_s18, %s2122_s18  }
   0x8   : > { %p26_p0 = scmp.ge.s32.totalorder %s25_s25, 2  ;;  %p44_p1 = scmp.ne.s32.totalorder %s1575_s19, %s1571_s18 }
   0x9   : > { %p45_p2 = scmp.eq.s32.totalorder %s1595_s24, 0  ;;  %s37_s30 = sadd.s32 1, %s1575_s19 }
   0xa   : > { %s2129_s25 = smov (%p26_p0, %s25_s25), 0  ;;  %s2131_s26 = smov (!%p26_p0, %s28_s26), %s1591_s23 }
   0xb   : > { %p46_p3 = por %p45_p2, %p44_p1  ;;  %p30_p4 = scmp.ge.s32.totalorder %s2131_s26, 2 }
   0xc   : > { %s33_s27 = ssub.s32 %s1587_s22, %s2129_s25  ;;  %p1299_p6 = scmp.ge.s32.totalorder %s1595_s24, 4 }
   0xd   : > { %s2133_s26 = smov (%p30_p4, %s2131_s26), 0 }
   0xe   : > { %s32_s28 = ssub.s32 %s1591_s23, %s2133_s26  ;;  %200 = sbr.rel (%p1299_p6) target bundleno = 41 (0x29), region = 16 }
   0xf   : > { %s34_s29 = sor.u32 %s33_s27, %s32_s28 }
  0x10   : > { %p35_p5 = scmp.eq.s32.totalorder %s34_s29, 0 }
  0x12   : > { %s1679_s6 = scalar_select %p35_p5, %s1575_s19, %s37_s30  }
  0x15   : > { %203 = sbr.rel (!%p46_p3) target bundleno = 41 (0x29), region = 20  ;;  %s205_s7 = sand.u32 (%p46_p3), 1, %s1575_s19  }
  0x16   : > { %s1335_s8 = sshll.u32 (%p46_p3), %s1591_s23, 5  ;;  %s1300_s9 = sshll.u32 (%p46_p3), %s205_s7, 6 }
  0x17   : > { %s210_s10 = sadd.s32 (%p46_p3), %s1587_s22, %s1335_s8  ;;  %s2119_s0 = sld [smem:[#allocation4_spill]] (%p46_p3) }
  0x18   : > { %s1303_s11 = sshll.u32 (%p46_p3), %s210_s10, 2  ;;  %s207_s15 = scalar_lea.vmem (%p46_p3), [#allocation3], %s1300_s9 }
  0x1d   : > { %s1688_s14 = scalar_lea.vmem %s2119_s0, %s1303_s11 }
  0x1e   : > { %v228_v0 = vld [vmem:[%s1688_s14] sm:$0xf]  ;;  %v230_v1 = vld [vmem:[%s1688_s14 + $0x8] sm:$0xf]  ;;  %v232_v2 = vld [vmem:[%s1688_s14 + $0x10] sm:$0xf] }
  0x1f   : > { %229 = vst [vmem:[%s207_s15] sm:$0xf] %v228_v0  ;;  %231 = vst [vmem:[%s207_s15 + $0x4] sm:$0xf] %v230_v1  ;;  %v234_v3 = vld [vmem:[%s1688_s14 + $0x18] sm:$0xf] }
  0x20   : > { %233 = vst [vmem:[%s207_s15 + $0x8] sm:$0xf] %v232_v2  ;;  %v236_v4 = vld [vmem:[%s1688_s14 + $0x20] sm:$0xf]  ;;  %v238_v5 = vld [vmem:[%s1688_s14 + $0x28] sm:$0xf] }
  0x21   : > { %235 = vst [vmem:[%s207_s15 + $0xc] sm:$0xf] %v234_v3  ;;  %237 = vst [vmem:[%s207_s15 + $0x10] sm:$0xf] %v236_v4  ;;  %v240_v6 = vld [vmem:[%s1688_s14 + $0x30] sm:$0xf] }
  0x22   : > { %239 = vst [vmem:[%s207_s15 + $0x14] sm:$0xf] %v238_v5  ;;  %v242_v7 = vld [vmem:[%s1688_s14 + $0x38] sm:$0xf]  ;;  %v244_v8 = vld [vmem:[%s1688_s14 + $0x40] sm:$0xf] }
  0x23   : > { %241 = vst [vmem:[%s207_s15 + $0x18] sm:$0xf] %v240_v6  ;;  %243 = vst [vmem:[%s207_s15 + $0x1c] sm:$0xf] %v242_v7  ;;  %v246_v9 = vld [vmem:[%s1688_s14 + $0x48] sm:$0xf] }
  0x24   : > { %245 = vst [vmem:[%s207_s15 + $0x20] sm:$0xf] %v244_v8  ;;  %v248_v10 = vld [vmem:[%s1688_s14 + $0x50] sm:$0xf]  ;;  %v250_v11 = vld [vmem:[%s1688_s14 + $0x58] sm:$0xf] }
  0x25   : > { %247 = vst [vmem:[%s207_s15 + $0x24] sm:$0xf] %v246_v9  ;;  %249 = vst [vmem:[%s207_s15 + $0x28] sm:$0xf] %v248_v10  ;;  %v252_v12 = vld [vmem:[%s1688_s14 + $0x60] sm:$0xf] }
  0x26   : > { %251 = vst [vmem:[%s207_s15 + $0x2c] sm:$0xf] %v250_v11  ;;  %v254_v13 = vld [vmem:[%s1688_s14 + $0x68] sm:$0xf]  ;;  %v256_v14 = vld [vmem:[%s1688_s14 + $0x70] sm:$0xf] }
  0x27   : > { %253 = vst [vmem:[%s207_s15 + $0x30] sm:$0xf] %v252_v12  ;;  %255 = vst [vmem:[%s207_s15 + $0x34] sm:$0xf] %v254_v13  ;;  %v258_v15 = vld [vmem:[%s1688_s14 + $0x78] sm:$0xf] }
  0x28   : > { %257 = vst [vmem:[%s207_s15 + $0x38] sm:$0xf] %v256_v14  ;;  %259 = vst [vmem:[%s207_s15 + $0x3c] sm:$0xf] %v258_v15 }
  0x29 PF: > { %p1304_p7 = scmp.ge.s32.totalorder %s1595_s24, 1  ;;  %p331_p8 = scmp.lt.s32.totalorder %s1595_s24, 5 }
  0x2b   : > { %p332_p9 = pnand %p1304_p7, %p331_p8 }
  0x2c   : > { %s338_s16 = sand.u32 (!%p332_p9), 1, %s1571_s18   ;;  %s1306_s17 = sshll.u32 (!%p332_p9), %s1579_s20, 4 }
  0x2d   : > { %335 = sbr.rel (%p332_p9) target bundleno = 672 (0x2a0), region = 69  ;;  %s1305_s27 = sshll.u32 (!%p332_p9), %s338_s16, 6 }
  0x2e   : > { %p385_p10 = scmp.lt.s32.totalorder (!%p332_p9), %s1306_s17, 31  ;;  %s1308_s28 = sshll.u32 (!%p332_p9), %s1583_s21, 4 }
  0x2f   : > { %p391_p11 = scmp.lt.s32.totalorder (!%p332_p9), %s1308_s28, 31  ;;  %p402_p12 = scmp.lt.s32.totalorder (!%p332_p9), %s1583_s21, 1 }
  0x30   : > { %s2120_s1 = sld [smem:[#allocation5_spill]] (!%p332_p9)  ;;  %p1315_p13 = scmp.ne.s32.totalorder (!%p332_p9), %s1579_s20, 0 }
  0x34   : > { %s2135_s17 = smov (!%p385_p10, %s1306_s17), 31  ;;  %s2137_s28 = smov (!%p391_p11, %s1308_s28), 31 }
  0x35   : > { %s1307_s29 = sshll.u32 %s2135_s17, 2  ;;  %s1309_s11 = sshll.u32 %s2137_s28, 3  ;;  %v1597_v16 = vmov (!%p1315_p13), 0.0  }
  0x36   : > { %s1716_s9 = scalar_lea.vmem %s2120_s1, %s1307_s29  ;;  %s1722_s18 = scalar_lea.vmem %s2113_s2, %s1309_s11  ;;  %416 = vst [vmem:[#allocation2] sm:$0xff] (!%p1315_p13), %v1597_v16  ;;  %417 = vst [vmem:[#allocation2 + $0x8] sm:$0xff] (!%p1315_p13), %v1597_v16 }
  0x37   : > { %s403_s10 = scalar_select %p402_p12, %s1583_s21, 1 }
  0x38   : > { %s1727_s16 = scalar_lea.vmem %s2114_s3, %s1309_s11  ;;  %s1739_s1 = scalar_lea.vmem [#allocation3], %s1305_s27  ;;  %418 = vst [vmem:[#allocation2 + $0x10] sm:$0xff] (!%p1315_p13), %v1597_v16  ;;  %419 = vst [vmem:[#allocation2 + $0x18] sm:$0xff] (!%p1315_p13), %v1597_v16 }
  0x39   : > { %s1312_s17 = sshll.u32 %s403_s10, 3  ;;  %415 = sbr.rel (%p1315_p13) target bundleno = 64 (0x40), region = 77  ;;  %420 = vst [vmem:[#allocation2 + $0x20] sm:$0xff] (!%p1315_p13), %v1597_v16  ;;  %421 = vst [vmem:[#allocation2 + $0x28] sm:$0xff] (!%p1315_p13), %v1597_v16 }
  0x3a   : > { %s1732_s7 = scalar_lea.vmem %s2115_s4, %s1312_s17  ;;  %s1737_s28 = scalar_lea.vmem %s2116_s5, %s1312_s17  ;;  %422 = vst [vmem:[#allocation2 + $0x30] sm:$0xff] (!%p1315_p13), %v1597_v16  ;;  %423 = vst [vmem:[#allocation2 + $0x38] sm:$0xff] (!%p1315_p13), %v1597_v16 }
  0x3b   : > { %424 = vst [vmem:[#allocation2 + $0x40] sm:$0xff] (!%p1315_p13), %v1597_v16  ;;  %425 = vst [vmem:[#allocation2 + $0x48] sm:$0xff] (!%p1315_p13), %v1597_v16 }
  0x3c   : > { %426 = vst [vmem:[#allocation2 + $0x50] sm:$0xff] (!%p1315_p13), %v1597_v16  ;;  %427 = vst [vmem:[#allocation2 + $0x58] sm:$0xff] (!%p1315_p13), %v1597_v16 }
  0x3d   : > { %428 = vst [vmem:[#allocation2 + $0x60] sm:$0xff] (!%p1315_p13), %v1597_v16  ;;  %429 = vst [vmem:[#allocation2 + $0x68] sm:$0xff] (!%p1315_p13), %v1597_v16 }
  0x3e   : > { %430 = vst [vmem:[#allocation2 + $0x70] sm:$0xff] (!%p1315_p13), %v1597_v16  ;;  %431 = vst [vmem:[#allocation2 + $0x78] sm:$0xff] (!%p1315_p13), %v1597_v16 }
  0x40 PF: > { %v1461_v17 = vld [vmem:[%s1716_s9] sm:$0xff]   ;;  %v1462_v18 = vld [vmem:[%s1716_s9 + $0x8] sm:$0xff]   ;;  %v1463_v19 = vld [vmem:[%s1716_s9 + $0x10] sm:$0xff]   ;;  %p1332_p0 = scmp.ne.s32.totalorder %s1579_s20, 1 }
  0x41   : > { %1352 = vmatprep.subr.bf16.mxu0 %v1461_v17  ;;  %1384 = vmatprep.subr.bf16.mxu1 %v1461_v17  ;;  %v1464_v20 = vld [vmem:[%s1716_s9 + $0x18] sm:$0xff]   ;;  %v1469_v21 = vld [vmem:[%s1739_s1] sm:$0xff]   ;;  %v1466_v24 = vld [vmem:[%s1716_s9 + $0x28] sm:$0xff]   ;;  %s2121_s0 = sshll.u32 (!%p1332_p0), %s1583_s21, 7 }
  0x42   : > { %1353 = vmatpush3.bf16.msra.mxu0 %v1461_v17  ;;  %1392 = vmatpush3.bf16.msra.mxu1 %v1461_v17  ;;  %v1470_v22 = vld [vmem:[%s1739_s1 + $0x20] sm:$0xff]   ;;  %v1467_v25 = vld [vmem:[%s1716_s9 + $0x30] sm:$0xff]   ;;  %v1468_v26 = vld [vmem:[%s1716_s9 + $0x38] sm:$0xff]  }
  0x43   : > { %1354 = vmatprep.subr.bf16.mxu0 %v1462_v18  ;;  %1385 = vmatprep.subr.bf16.mxu1 %v1462_v18  ;;  %v1465_v23 = vld [vmem:[%s1716_s9 + $0x20] sm:$0xff]   ;;  %v1471_v27 = vld [vmem:[%s1739_s1 + $0x8] sm:$0xff]   ;;  %v1473_v29 = vld [vmem:[%s1739_s1 + $0x10] sm:$0xff]  }
  0x44   : > { %1368 = vmatprep.mubr.bf16.mxu0 %v1469_v21  ;;  %1376 = vmatprep.mubr.bf16.mxu1 %v1470_v22  ;;  %v1472_v28 = vld [vmem:[%s1739_s1 + $0x28] sm:$0xff]   ;;  %v1474_v30 = vld [vmem:[%s1739_s1 + $0x30] sm:$0xff]   ;;  %v1475_v31 = vld [vmem:[%s1739_s1 + $0x18] sm:$0xff]   ;;  %v1762_v22 = vstv (!%p1332_p0), %s2121_s0 }
  0x45   : > { %v1476_v32 = vld [vmem:[%s1739_s1 + $0x38] sm:$0xff]   ;;  %v434_v33 = vld [vmem:[#allocation2 + $0x10] sm:$0xff]  ;;  %v432_v35 = vld [vmem:[#allocation2] sm:$0xff] }
  0x46   : > { %1355 = vmatpush3.bf16.msra.mxu0 %v1462_v18  ;;  %1393 = vmatpush3.bf16.msra.mxu1 %v1462_v18  ;;  %v442_v34 = vld [vmem:[#allocation2 + $0x50] sm:$0xff]  ;;  %v440_v36 = vld [vmem:[#allocation2 + $0x40] sm:$0xff]  ;;  %v435_v39 = vld [vmem:[#allocation2 + $0x18] sm:$0xff] }
  0x47   : > { %1356 = vmatprep.subr.bf16.mxu0 %v1463_v19  ;;  %1386 = vmatprep.subr.bf16.mxu1 %v1463_v19  ;;  %v443_v40 = vld [vmem:[#allocation2 + $0x58] sm:$0xff]  ;;  %v433_v45 = vld [vmem:[#allocation2 + $0x8] sm:$0xff]  ;;  %v438_v57 = vld [vmem:[#allocation2 + $0x30] sm:$0xff] }
  0x48   : > { %v441_v46 = vld [vmem:[#allocation2 + $0x48] sm:$0xff]  ;;  %v446_v58 = vld [vmem:[#allocation2 + $0x70] sm:$0xff]  ;;  %v436_v59 = vld [vmem:[#allocation2 + $0x20] sm:$0xff] }
  0x49   : > { %v444_v60 = vld [vmem:[#allocation2 + $0x60] sm:$0xff]  ;;  %v439_v63 = vld [vmem:[#allocation2 + $0x38] sm:$0xff]  ;;  %v437_v5 = vld [vmem:[#allocation2 + $0x28] sm:$0xff] }
  0x4a   : > { %1357 = vmatpush3.bf16.msra.mxu0 %v1463_v19  ;;  %1394 = vmatpush3.bf16.msra.mxu1 %v1463_v19  ;;  %v447_v0 = vld [vmem:[#allocation2 + $0x78] sm:$0xff]  ;;  %v445_v6 = vld [vmem:[#allocation2 + $0x68] sm:$0xff]  ;;  %v725_v18 = vld [vmem:[%s1722_s18] sm:$0xff] (!%p1332_p0)  ;;  %v757_v19 = vlaneseq (!%p1332_p0) }
  0x4b   : > { %1358 = vmatprep.subr.bf16.mxu0 %v1464_v20  ;;  %1387 = vmatprep.subr.bf16.mxu1 %v1464_v20 }
  0x4e   : > { %1359 = vmatpush3.bf16.msra.mxu0 %v1464_v20  ;;  %1395 = vmatpush3.bf16.msra.mxu1 %v1464_v20 }
  0x4f   : > { %1360 = vmatprep.subr.bf16.mxu0 %v1465_v23  ;;  %1388 = vmatprep.subr.bf16.mxu1 %v1465_v23 }
  0x52   : > { %1361 = vmatpush3.bf16.msra.mxu0 %v1465_v23  ;;  %1396 = vmatpush3.bf16.msra.mxu1 %v1465_v23  ;;  %v727_v23 = vld [vmem:[%s1722_s18 + $0x10] sm:$0xff] (!%p1332_p0) }
  0x53   : > { %1362 = vmatprep.subr.bf16.mxu0 %v1466_v24  ;;  %1389 = vmatprep.subr.bf16.mxu1 %v1466_v24 }
  0x56   : > { %1363 = vmatpush3.bf16.msra.mxu0 %v1466_v24  ;;  %1397 = vmatpush3.bf16.msra.mxu1 %v1466_v24 }
  0x57   : > { %1364 = vmatprep.subr.bf16.mxu0 %v1467_v25  ;;  %1390 = vmatprep.subr.bf16.mxu1 %v1467_v25 }
  0x5a   : > { %1365 = vmatpush3.bf16.msra.mxu0 %v1467_v25  ;;  %1398 = vmatpush3.bf16.msra.mxu1 %v1467_v25  ;;  %v726_v25 = vld [vmem:[%s1722_s18 + $0x8] sm:$0xff] (!%p1332_p0) }
  0x5b   : > { %1366 = vmatprep.subr.bf16.mxu0 %v1468_v26  ;;  %1391 = vmatprep.subr.bf16.mxu1 %v1468_v26 }
  0x5e   : > { %1367 = vmatpush3.bf16.msra.mxu0 %v1468_v26  ;;  %1399 = vmatpush3.bf16.msra.mxu1 %v1468_v26  ;;  %v1766_v26 = vand.u32 (!%p1332_p0), 127, %v757_v19 }
  0x60   : > { %vm759_vm0 = vcmp.lt.s32.totalorder (!%p1332_p0), %v1766_v26, 8 }
  0x61   : > { %1369 = vmatmul.mubr.bf16.vlgmr.msra.gmra.mrb[0].mxu0 %v1471_v27  ;;  %1377 = vmatmul.mubr.bf16.vlgmr.msra.gmra.mrb[0].mxu1 %v1472_v28  ;;  %v1768_v27 = vshrl.u32 (!%p1332_p0), %v757_v19, 7 }
  0x62   : > { %1372 = vmatprep.mubr.bf16.mxu0 %v1473_v29  ;;  %1380 = vmatprep.mubr.bf16.mxu1 %v1474_v30 }
  0x69   : > { %1373 = vmatmul.mubr.bf16.gmra.mrb[4].mxu0 %v1475_v31  ;;  %1381 = vmatmul.mubr.bf16.gmra.mrb[4].mxu1 %v1476_v32  ;;  %v728_v31 = vld [vmem:[%s1722_s18 + $0x18] sm:$0xff] (!%p1332_p0) }
 0x134   : > { %v1370_v37 = vpop.f32.mrb[0].mxu0  ;;  %v1378_v38 = vpop.f32.mrb[0].mxu1 }
 0x135   : > { %v675_v41 = vadd.f32 %v1370_v37, %v434_v33  ;;  %v683_v42 = vadd.f32 %v1378_v38, %v442_v34  ;;  %v610_v43 = vpop.f32.mrb[1].mxu0  ;;  %v642_v44 = vpop.f32.mrb[1].mxu1  ;;  %v729_v34 = vld [vmem:[%s1722_s18 + $0x20] sm:$0xff] (!%p1332_p0)  ;;  %v986_v37 = vadd.s32 (!%p1332_p0), 8, %v1768_v27 }
 0x136   : > { %v673_v47 = vadd.f32 %v610_v43, %v432_v35  ;;  %v681_v48 = vadd.f32 %v642_v44, %v440_v36  ;;  %v1371_v49 = vpop.f32.mrb[2].mxu0  ;;  %v1379_v50 = vpop.f32.mrb[2].mxu1  ;;  %v1002_v35 = vadd.s32 (!%p1332_p0), %v1762_v22, %v1768_v27  ;;  %v987_v36 = vadd.s32 (!%p1332_p0), 16, %v1768_v27 }
 0x137   : > { %691 = vst [vmem:[#allocation2 + $0x10] sm:$0xff] %v675_v41  ;;  %699 = vst [vmem:[#allocation2 + $0x50] sm:$0xff] %v683_v42  ;;  %v676_v51 = vadd.f32 %v1371_v49, %v435_v39  ;;  %v684_v52 = vadd.f32 %v1379_v50, %v443_v40  ;;  %v613_v53 = vpop.f32.mrb[3].mxu0  ;;  %v645_v54 = vpop.f32.mrb[3].mxu1  ;;  %v730_v39 = vld [vmem:[%s1722_s18 + $0x28] sm:$0xff] (!%p1332_p0)  ;;  %v989_v49 = vadd.s32 (!%p1332_p0), 32, %v1768_v27 }
 0x138   : > { %689 = vst [vmem:[#allocation2] sm:$0xff] %v673_v47  ;;  %697 = vst [vmem:[#allocation2 + $0x40] sm:$0xff] %v681_v48  ;;  %v674_v55 = vadd.f32 %v613_v53, %v433_v45  ;;  %v682_v56 = vadd.f32 %v645_v54, %v441_v46  ;;  %vm1018_vm1 = vcmp.lt.s32.totalorder (!%p1332_p0), %v1002_v35, 256  ;;  %v1004_v44 = vadd.s32 (!%p1332_p0), %v1762_v22, %v987_v36 }
 0x139   : > { %692 = vst [vmem:[#allocation2 + $0x18] sm:$0xff] %v676_v51  ;;  %700 = vst [vmem:[#allocation2 + $0x58] sm:$0xff] %v684_v52  ;;  %v1003_v45 = vadd.s32 (!%p1332_p0), %v1762_v22, %v986_v37  ;;  %v988_v47 = vadd.s32 (!%p1332_p0), 24, %v1768_v27  ;;  %v731_v52 = vld [vmem:[%s1722_s18 + $0x30] sm:$0xff] (!%p1332_p0)  ;;  %v990_v54 = vadd.s32 (!%p1332_p0), 40, %v1768_v27 }
 0x13a   : > { %690 = vst [vmem:[#allocation2 + $0x8] sm:$0xff] %v674_v55  ;;  %698 = vst [vmem:[#allocation2 + $0x48] sm:$0xff] %v682_v56  ;;  %vm1020_vm3 = vcmp.lt.s32.totalorder (!%p1332_p0), %v1004_v44, 256  ;;  %v994_v44 = vadd.s32 (!%p1332_p0), 72, %v1768_v27 }
 0x13b   : > { %vm1034_vm2 = vmand (!%p1332_p0), %vm1018_vm1, %vm759_vm0  ;;  %vm1019_vm4 = vcmp.lt.s32.totalorder (!%p1332_p0), %v1003_v45, 256  ;;  %v1005_v56 = vadd.s32 (!%p1332_p0), %v1762_v22, %v988_v47  ;;  %v736_v45 = vld [vmem:[%s1722_s18 + $0x58] sm:$0xff] (!%p1332_p0) }
 0x13c   : > { %v1374_v61 = vpop.f32.mrb[4].mxu0  ;;  %v1382_v62 = vpop.f32.mrb[4].mxu1  ;;  %708 = sbr.rel (%p1332_p0) target bundleno = 672 (0x2a0), region = 81  ;;  %vm1036_vm5 = vmand (!%p1332_p0), %vm1020_vm3, %vm759_vm0 }
 0x13d   : > { %v679_v1 = vadd.f32 %v1374_v61, %v438_v57  ;;  %v687_v2 = vadd.f32 %v1382_v62, %v446_v58  ;;  %v626_v3 = vpop.f32.mrb[5].mxu0  ;;  %v658_v4 = vpop.f32.mrb[5].mxu1  ;;  %v1006_v57 = vadd.s32 (!%p1332_p0), %v1762_v22, %v989_v49  ;;  %vm1035_vm6 = vmand (!%p1332_p0), %vm1019_vm4, %vm759_vm0  ;;  %v991_v62 = vadd.s32 (!%p1332_p0), 48, %v1768_v27 }
 0x13e   : > { %v677_v7 = vadd.f32 %v626_v3, %v436_v59  ;;  %v685_v8 = vadd.f32 %v658_v4, %v444_v60  ;;  %v1375_v9 = vpop.f32.mrb[6].mxu0  ;;  %v1383_v10 = vpop.f32.mrb[6].mxu1  ;;  %v711_v20 = vld [vmem:[#allocation2 + $0x10] sm:$0xff] (!%p1332_p0)  ;;  %v1007_v60 = vadd.s32 (!%p1332_p0), %v1762_v22, %v990_v54  ;;  %vm1021_vm7 = vcmp.lt.s32.totalorder (!%p1332_p0), %v1005_v56, 256 }
 0x13f   : > { %695 = vst [vmem:[#allocation2 + $0x30] sm:$0xff] %v679_v1  ;;  %703 = vst [vmem:[#allocation2 + $0x70] sm:$0xff] %v687_v2  ;;  %v680_v11 = vadd.f32 %v1375_v9, %v439_v63  ;;  %v688_v12 = vadd.f32 %v1383_v10, %v447_v0  ;;  %v629_v13 = vpop.f32.mrb[7].mxu0  ;;  %v661_v14 = vpop.f32.mrb[7].mxu1  ;;  %v709_v17 = vld [vmem:[#allocation2] sm:$0xff] (!%p1332_p0)  ;;  %v743_v28 = vadd.f32 (!%p1332_p0), %v727_v23, %v711_v20  ;;  %v732_v0 = vld [vmem:[%s1722_s18 + $0x38] sm:$0xff] (!%p1332_p0) }
 0x140   : > { %693 = vst [vmem:[#allocation2 + $0x20] sm:$0xff] %v677_v7  ;;  %701 = vst [vmem:[#allocation2 + $0x60] sm:$0xff] %v685_v8  ;;  %v678_v15 = vadd.f32 %v629_v13, %v437_v5  ;;  %v686_v16 = vadd.f32 %v661_v14, %v445_v6  ;;  %v741_v21 = vadd.f32 (!%p1332_p0), %v725_v18, %v709_v17  ;;  %v712_v30 = vld [vmem:[#allocation2 + $0x18] sm:$0xff] (!%p1332_p0)  ;;  %vm1022_vm8 = vcmp.lt.s32.totalorder (!%p1332_p0), %v1006_v57, 256  ;;  %v717_v10 = vld [vmem:[#allocation2 + $0x40] sm:$0xff] (!%p1332_p0) }
 0x141   : > { %696 = vst [vmem:[#allocation2 + $0x38] sm:$0xff] %v680_v11  ;;  %704 = vst [vmem:[#allocation2 + $0x78] sm:$0xff] %v688_v12  ;;  %v710_v24 = vld [vmem:[#allocation2 + $0x8] sm:$0xff] (!%p1332_p0)  ;;  %v744_v33 = vadd.f32 (!%p1332_p0), %v728_v31, %v712_v30  ;;  %v1784_v41 = vsel (!%p1332_p0), %vm759_vm0, %v743_v28, -1e+30  ;;  %v1052_v59 = vsel (!%p1332_p0), %vm1036_vm5, %v743_v28, 0.0  ;;  %v1008_v7 = vadd.s32 (!%p1332_p0), %v1762_v22, %v991_v62 }
 0x142   : > { %694 = vst [vmem:[#allocation2 + $0x28] sm:$0xff] %v678_v15  ;;  %702 = vst [vmem:[#allocation2 + $0x68] sm:$0xff] %v686_v16  ;;  %v742_v29 = vadd.f32 (!%p1332_p0), %v726_v25, %v710_v24  ;;  %v1780_v40 = vsel (!%p1332_p0), %vm759_vm0, %v741_v21, -1e+30  ;;  %780 = vmax.xlane.f32.xlu1 (!%p1332_p0), %v1784_v41  ;;  %v1050_v53 = vsel (!%p1332_p0), %vm1034_vm2, %v741_v21, 0.0  ;;  %v1092_v1 = vmul.f32 (!%p1332_p0), %v1052_v59, %v1052_v59  ;;  %v733_v11 = vld [vmem:[%s1722_s18 + $0x40] sm:$0xff] (!%p1332_p0) }
 0x143   : > { %776 = vmax.xlane.f32.xlu0 %v1780_v40  ;;  %v1796_v46 = vsel %vm759_vm0, %v744_v33, -1e+30  ;;  %v1090_v55 = vmul.f32 %v1050_v53, %v1050_v53  ;;  %vm1037_vm9 = vmand %vm1021_vm7, %vm759_vm0  ;;  %vm1023_vm10 = vcmp.lt.s32.totalorder %v1007_v60, 256  ;;  %v992_v9 = vadd.s32 56, %v1768_v27  ;;  %v718_v16 = vld [vmem:[#allocation2 + $0x48] sm:$0xff]  ;;  %v720_v37 = vld [vmem:[#allocation2 + $0x58] sm:$0xff] }
 0x144   : > { %v1788_v42 = vsel %vm759_vm0, %v742_v29, -1e+30  ;;  %v1051_v2 = vsel %vm1035_vm6, %v742_v29, 0.0  ;;  %v1053_v6 = vsel %vm1037_vm9, %v744_v33, 0.0  ;;  %vm1038_vm11 = vmand %vm1022_vm8, %vm759_vm0  ;;  %v734_v17 = vld [vmem:[%s1722_s18 + $0x48] sm:$0xff]  ;;  %vm1024_vm13 = vcmp.lt.s32.totalorder %v1008_v7, 256 }
 0x145   : > { %v1066_v3 = vadd.f32 %v1051_v2, %v1050_v53  ;;  %v1091_v4 = vmul.f32 %v1051_v2, %v1051_v2  ;;  %v1093_v13 = vmul.f32 %v1053_v6, %v1053_v6  ;;  %vm1039_vm12 = vmand %vm1023_vm10, %vm759_vm0  ;;  %v1009_v25 = vadd.s32 %v1762_v22, %v992_v9  ;;  %v735_v33 = vld [vmem:[%s1722_s18 + $0x50] sm:$0xff]  ;;  %v738_v7 = vld [vmem:[%s1722_s18 + $0x68] sm:$0xff] }
 0x146   : > { %v715_v51 = vld [vmem:[#allocation2 + $0x30] sm:$0xff]  ;;  %782 = vmax.xlane.f32.xlu1 %v1796_v46  ;;  %vm1040_vm14 = vmand %vm1024_vm13, %vm759_vm0  ;;  %v749_v29 = vadd.f32 %v733_v11, %v717_v10  ;;  %v993_v30 = vadd.s32 64, %v1768_v27  ;;  %v750_v31 = vadd.f32 %v734_v17, %v718_v16  ;;  %v1011_v53 = vadd.s32 %v1762_v22, %v994_v44 }
 0x147   : > { %v713_v32 = vld [vmem:[#allocation2 + $0x20] sm:$0xff]  ;;  %778 = vmax.xlane.f32.xlu0 %v1788_v42  ;;  %v747_v61 = vadd.f32 %v731_v52, %v715_v51  ;;  %v1106_v12 = vadd.f32 %v1091_v4, %v1090_v55  ;;  %v1067_v14 = vadd.f32 %v1066_v3, %v1052_v59  ;;  %vm1025_vm15 = vcmp.lt.s32.totalorder %v1009_v25, 256  ;;  %v739_v16 = vld [vmem:[%s1722_s18 + $0x70] sm:$0xff] }
 0x148   : > { %v745_v43 = vadd.f32 %v729_v34, %v713_v32  ;;  %v716_v63 = vld [vmem:[#allocation2 + $0x38] sm:$0xff]  ;;  %v719_v32 = vld [vmem:[#allocation2 + $0x50] sm:$0xff]  ;;  %vm1041_vm1 = vmand %vm1025_vm15, %vm759_vm0  ;;  %v995_v54 = vadd.s32 80, %v1768_v27  ;;  %v752_v59 = vadd.f32 %v736_v45, %v720_v37  ;;  %vm1027_vm4 = vcmp.lt.s32.totalorder %v1011_v53, 256 }
 0x149   : > { %v714_v38 = vld [vmem:[#allocation2 + $0x28] sm:$0xff]  ;;  %v1827_v5 = vsel %vm759_vm0, %v747_v61, -1e+30  ;;  %v748_v8 = vadd.f32 %v732_v0, %v716_v63  ;;  %v1068_v21 = vadd.f32 %v1067_v14, %v1053_v6  ;;  %v1107_v23 = vadd.f32 %v1106_v12, %v1092_v1  ;;  %v721_v60 = vld [vmem:[#allocation2 + $0x60] sm:$0xff]  ;;  %vm1043_vm5 = vmand %vm1027_vm4, %vm759_vm0 }
 0x14a   : > { %v1803_v48 = vsel %vm759_vm0, %v745_v43, -1e+30  ;;  %v746_v50 = vadd.f32 %v730_v39, %v714_v38  ;;  %v1054_v15 = vsel %vm1038_vm11, %v745_v43, 0.0  ;;  %v1056_v28 = vsel %vm1040_vm14, %v747_v61, 0.0  ;;  %v737_v61 = vld [vmem:[%s1722_s18 + $0x60] sm:$0xff]  ;;  %v722_v6 = vld [vmem:[#allocation2 + $0x68] sm:$0xff] }
 0x14b   : > { %784 = vmax.xlane.f32.xlu0 %v1803_v48  ;;  %v1094_v18 = vmul.f32 %v1054_v15, %v1054_v15  ;;  %v1841_v20 = vsel %vm759_vm0, %v748_v8, -1e+30  ;;  %v1108_v34 = vadd.f32 %v1107_v23, %v1093_v13  ;;  %v1069_v35 = vadd.f32 %v1068_v21, %v1054_v15  ;;  %v723_v15 = vld [vmem:[#allocation2 + $0x70] sm:$0xff] }
 0x14c   : > { %v1814_v58 = vsel %vm759_vm0, %v746_v50, -1e+30  ;;  %v1055_v19 = vsel %vm1039_vm12, %v746_v50, 0.0  ;;  %v1096_v36 = vmul.f32 %v1056_v28, %v1056_v28  ;;  %v1854_v38 = vsel %vm759_vm0, %v749_v29, -1e+30 }
 0x14d   : > { %786 = vmax.xlane.f32.xlu1 %v1814_v58  ;;  %v1095_v24 = vmul.f32 %v1055_v19, %v1055_v19  ;;  %v1010_v39 = vadd.s32 %v1762_v22, %v993_v30  ;;  %v1859_v43 = vsel %vm759_vm0, %v750_v31, -1e+30  ;;  %v1109_v47 = vadd.f32 %v1108_v34, %v1094_v18 }
 0x14e   : > { %v1070_v49 = vadd.f32 %v1069_v35, %v1055_v19  ;;  %v1057_v50 = vsel %vm1041_vm1, %v748_v8, 0.0  ;;  %v751_v51 = vadd.f32 %v735_v33, %v719_v32  ;;  %v1012_v63 = vadd.s32 %v1762_v22, %v995_v54 }
 0x14f   : > { %788 = vmax.xlane.f32.xlu0 %v1827_v5  ;;  %v1097_v52 = vmul.f32 %v1057_v50, %v1057_v50  ;;  %vm1026_vm2 = vcmp.lt.s32.totalorder %v1010_v39, 256  ;;  %v1110_v55 = vadd.f32 %v1109_v47, %v1095_v24  ;;  %v996_v0 = vadd.s32 88, %v1768_v27 }
 0x150   : > { %v1071_v56 = vadd.f32 %v1070_v49, %v1056_v28  ;;  %vm1042_vm3 = vmand %vm1026_vm2, %vm759_vm0  ;;  %v1871_v57 = vsel %vm759_vm0, %v751_v51, -1e+30  ;;  %v1880_v4 = vsel %vm759_vm0, %v752_v59, -1e+30  ;;  %v1059_v8 = vsel %vm1043_vm5, %v750_v31, 0.0  ;;  %v724_v28 = vld [vmem:[#allocation2 + $0x78] sm:$0xff] }
 0x151   : > { %790 = vmax.xlane.f32.xlu1 %v1841_v20  ;;  %v1058_v62 = vsel %vm1042_vm3, %v749_v29, 0.0  ;;  %v1111_v1 = vadd.f32 %v1110_v55, %v1096_v36  ;;  %vm1028_vm6 = vcmp.lt.s32.totalorder %v1012_v63, 256  ;;  %v1013_v9 = vadd.s32 %v1762_v22, %v996_v0  ;;  %v740_v29 = vld [vmem:[%s1722_s18 + $0x78] sm:$0xff] }
 0x152   : > { %v1072_v2 = vadd.f32 %v1071_v56, %v1057_v50  ;;  %v1098_v3 = vmul.f32 %v1058_v62, %v1058_v62  ;;  %v753_v10 = vadd.f32 %v737_v61, %v721_v60  ;;  %v1099_v13 = vmul.f32 %v1059_v8, %v1059_v8  ;;  %vm1044_vm7 = vmand %vm1028_vm6, %vm759_vm0 }
 0x153   : > { %792 = vmax.xlane.f32.xlu0 %v1854_v38  ;;  %v1112_v11 = vadd.f32 %v1111_v1, %v1097_v52  ;;  %v997_v14 = vadd.s32 96, %v1768_v27  ;;  %v1060_v17 = vsel %vm1044_vm7, %v751_v51, 0.0  ;;  %vm1029_vm8 = vcmp.lt.s32.totalorder %v1013_v9, 256 }
 0x154   : > { %v1073_v12 = vadd.f32 %v1072_v2, %v1058_v62  ;;  %v1892_v18 = vsel %vm759_vm0, %v753_v10, -1e+30  ;;  %v754_v19 = vadd.f32 %v738_v7, %v722_v6  ;;  %v1100_v24 = vmul.f32 %v1060_v17, %v1060_v17  ;;  %vm1045_vm9 = vmand %vm1029_vm8, %vm759_vm0 }
 0x155   : > { %794 = vmax.xlane.f32.xlu1 %v1859_v43  ;;  %v1113_v21 = vadd.f32 %v1112_v11, %v1098_v3  ;;  %v1014_v25 = vadd.s32 %v1762_v22, %v997_v14  ;;  %v1061_v30 = vsel %vm1045_vm9, %v752_v59, 0.0  ;;  %v998_v32 = vadd.s32 104, %v1768_v27 }
 0x156   : > { %v1074_v23 = vadd.f32 %v1073_v12, %v1059_v8  ;;  %v1900_v31 = vsel %vm759_vm0, %v754_v19, -1e+30  ;;  %v755_v33 = vadd.f32 %v739_v16, %v723_v15  ;;  %v1101_v36 = vmul.f32 %v1061_v30, %v1061_v30 }
 0x157   : > { %796 = vmax.xlane.f32.xlu0 %v1871_v57  ;;  %v1114_v34 = vadd.f32 %v1113_v21, %v1099_v13  ;;  %vm1030_vm10 = vcmp.lt.s32.totalorder %v1014_v25, 256  ;;  %v1015_v37 = vadd.s32 %v1762_v22, %v998_v32  ;;  %v999_v44 = vadd.s32 112, %v1768_v27 }
 0x158   : > { %v1075_v35 = vadd.f32 %v1074_v23, %v1060_v17  ;;  %vm1046_vm11 = vmand %vm1030_vm10, %vm759_vm0  ;;  %v1910_v39 = vsel %vm759_vm0, %v755_v33, -1e+30  ;;  %v756_v45 = vadd.f32 %v740_v29, %v724_v28  ;;  %v1000_v51 = vadd.s32 120, %v1768_v27 }
 0x159   : > { %798 = vmax.xlane.f32.xlu1 %v1880_v4  ;;  %v1115_v47 = vadd.f32 %v1114_v34, %v1100_v24  ;;  %v1062_v50 = vsel %vm1046_vm11, %v753_v10, 0.0  ;;  %vm1031_vm12 = vcmp.lt.s32.totalorder %v1015_v37, 256  ;;  %v1016_v53 = vadd.s32 %v1762_v22, %v999_v44 }
 0x15a   : > { %v1076_v49 = vadd.f32 %v1075_v35, %v1061_v30  ;;  %v1102_v52 = vmul.f32 %v1062_v50, %v1062_v50  ;;  %v1917_v54 = vsel %vm759_vm0, %v756_v45, -1e+30  ;;  %vm1047_vm13 = vmand %vm1031_vm12, %vm759_vm0  ;;  %v1017_v59 = vadd.s32 %v1762_v22, %v1000_v51 }
 0x15b   : > { %800 = vmax.xlane.f32.xlu0 %v1892_v18  ;;  %v1116_v55 = vadd.f32 %v1115_v47, %v1101_v36  ;;  %v1063_v27 = vsel %vm1047_vm13, %v754_v19, 0.0  ;;  %vm1032_vm14 = vcmp.lt.s32.totalorder %v1016_v53, 256 }
 0x15c   : > { %v1077_v56 = vadd.f32 %v1076_v49, %v1062_v50  ;;  %v1103_v60 = vmul.f32 %v1063_v27, %v1063_v27  ;;  %vm1048_vm15 = vmand %vm1032_vm14, %vm759_vm0  ;;  %vm1033_vm1 = vcmp.lt.s32.totalorder %v1017_v59, 256 }
 0x15d   : > { %802 = vmax.xlane.f32.xlu1 %v1900_v31  ;;  %v1117_v61 = vadd.f32 %v1116_v55, %v1102_v52  ;;  %v1064_v63 = vsel %vm1048_vm15, %v755_v33, 0.0  ;;  %vm1049_vm2 = vmand %vm1033_vm1, %vm759_vm0 }
 0x15e   : > { %v1078_v62 = vadd.f32 %v1077_v56, %v1063_v27  ;;  %v1065_v0 = vsel %vm1049_vm2, %v756_v45, 0.0  ;;  %v1104_v1 = vmul.f32 %v1064_v63, %v1064_v63 }
 0x15f   : > { %804 = vmax.xlane.f32.xlu0 %v1910_v39  ;;  %v1118_v2 = vadd.f32 %v1117_v61, %v1103_v60  ;;  %v1105_v6 = vmul.f32 %v1065_v0, %v1065_v0 }
 0x160   : > { %v1079_v3 = vadd.f32 %v1078_v62, %v1064_v63 }
 0x161   : > { %806 = vmax.xlane.f32.xlu1 %v1917_v54  ;;  %v1119_v7 = vadd.f32 %v1118_v2, %v1104_v1 }
 0x162   : > { %v1080_v22 = vadd.f32 %v1079_v3, %v1065_v0 }
 0x163   : > { %v1120_v8 = vadd.f32 %v1119_v7, %v1105_v6 }
 0x164   : > { %1081 = vadd.xlane.f32.xlu0 %v1080_v22 }
 0x165   : > { %1121 = vadd.xlane.f32.xlu1 %v1120_v8 }
 0x1cf   : > { %v781_v10 = vpop.xlane.xlu1 %780 }
 0x1d0   : > { %v777_v9 = vpop.xlane.xlu0 %776  ;;  %v1932_v12 = vsub.f32 %v1784_v41, %v781_v10 }
 0x1d1   : > { %v1929_v11 = vsub.f32 %v1780_v40, %v777_v9 }
 0x1d2   : > { %v828_v14 = vmul.f32 1.442695, %v1932_v12 }
 0x1d3   : > { %v824_v13 = vmul.f32 1.442695, %v1929_v11  ;;  %v783_v16 = vpop.xlane.xlu1 %782 }
 0x1d4   : > { %v779_v15 = vpop.xlane.xlu0 %778  ;;  %v1940_v19 = vsub.f32 %v1796_v46, %v783_v16 }
 0x1d5   : > { %1477 = vpow2.f32 %v824_v13  ;;  %v1937_v17 = vsub.f32 %v1788_v42, %v779_v15 }
 0x1d6   : > { %1479 = vpow2.f32 %v828_v14  ;;  %v830_v21 = vmul.f32 1.442695, %v1940_v19 }
 0x1d7   : > { %v826_v40 = vmul.f32 1.442695, %v1937_v17 }
 0x1d8   : > { %v785_v41 = vpop.xlane.xlu0 %784 }
 0x1d9   : > { %1481 = vpow2.f32 %v826_v40  ;;  %v1945_v24 = vsub.f32 %v1803_v48, %v785_v41 }
 0x1da   : > { %v787_v23 = vpop.xlane.xlu1 %786  ;;  %1483 = vpow2.f32 %v830_v21 }
 0x1db   : > { %v1948_v25 = vsub.f32 %v1814_v58, %v787_v23  ;;  %v832_v42 = vmul.f32 1.442695, %v1945_v24 }
 0x1dc   : > { %v789_v28 = vpop.xlane.xlu0 %788 }
 0x1dd   : > { %v834_v46 = vmul.f32 1.442695, %v1948_v25  ;;  %1485 = vpow2.f32 %v832_v42  ;;  %v1953_v30 = vsub.f32 %v1827_v5, %v789_v28 }
 0x1de   : > { %v791_v29 = vpop.xlane.xlu1 %790 }
 0x1df   : > { %v1956_v32 = vsub.f32 %v1841_v20, %v791_v29  ;;  %1487 = vpow2.f32 %v834_v46  ;;  %v1478_v48 = vpop.eup %1477  ;;  %v836_v33 = vmul.f32 1.442695, %v1953_v30 }
 0x1e0   : > { %v1480_v34 = vpop.eup %1479  ;;  %v793_v35 = vpop.xlane.xlu0 %792  ;;  %v856_v36 = vsel %vm759_vm0, %v1478_v48, 0.0 }
 0x1e1   : > { %v838_v58 = vmul.f32 1.442695, %v1956_v32  ;;  %1489 = vpow2.f32 %v836_v33  ;;  %v1963_v44 = vsub.f32 %v1854_v38, %v793_v35  ;;  %872 = vadd.xlane.f32.xlu0 %v856_v36  ;;  %v858_v20 = vsel %vm759_vm0, %v1480_v34, 0.0 }
 0x1e2   : > { %v795_v37 = vpop.xlane.xlu1 %794 }
 0x1e3   : > { %v1966_v5 = vsub.f32 %v1859_v43, %v795_v37  ;;  %1491 = vpow2.f32 %v838_v58  ;;  %v1482_v45 = vpop.eup %1481  ;;  %v840_v47 = vmul.f32 1.442695, %v1963_v44 }
 0x1e4   : > { %v1484_v50 = vpop.eup %1483  ;;  %v797_v51 = vpop.xlane.xlu0 %796  ;;  %v857_v52 = vsel %vm759_vm0, %v1482_v45, 0.0 }
 0x1e5   : > { %v842_v49 = vmul.f32 1.442695, %v1966_v5  ;;  %1493 = vpow2.f32 %v840_v47  ;;  %v1975_v53 = vsub.f32 %v1871_v57, %v797_v51  ;;  %876 = vadd.xlane.f32.xlu0 %v858_v20  ;;  %874 = vadd.xlane.f32.xlu1 %v857_v52  ;;  %v859_v55 = vsel %vm759_vm0, %v1484_v50, 0.0 }
 0x1e6   : > { %v799_v38 = vpop.xlane.xlu1 %798 }
 0x1e7   : > { %v1978_v43 = vsub.f32 %v1880_v4, %v799_v38  ;;  %1495 = vpow2.f32 %v842_v49  ;;  %v1486_v56 = vpop.eup %1485  ;;  %v844_v59 = vmul.f32 1.442695, %v1975_v53 }
 0x1e8   : > { %v801_v61 = vpop.xlane.xlu0 %800  ;;  %v860_v57 = vsel %vm759_vm0, %v1486_v56, 0.0 }
 0x1e9   : > { %v846_v27 = vmul.f32 1.442695, %v1978_v43  ;;  %v1488_v60 = vpop.eup %1487  ;;  %1497 = vpow2.f32 %v844_v59  ;;  %v1987_v63 = vsub.f32 %v1892_v18, %v801_v61  ;;  %878 = vadd.xlane.f32.xlu1 %v859_v55  ;;  %880 = vadd.xlane.f32.xlu0 %v860_v57 }
 0x1ea   : > { %v803_v62 = vpop.xlane.xlu1 %802  ;;  %v861_v0 = vsel %vm759_vm0, %v1488_v60, 0.0 }
 0x1eb   : > { %v1990_v4 = vsub.f32 %v1900_v31, %v803_v62  ;;  %1499 = vpow2.f32 %v846_v27  ;;  %v1490_v1 = vpop.eup %1489  ;;  %v848_v2 = vmul.f32 1.442695, %v1987_v63 }
 0x1ec   : > { %v805_v7 = vpop.xlane.xlu0 %804  ;;  %v862_v18 = vsel %vm759_vm0, %v1490_v1, 0.0 }
 0x1ed   : > { %v850_v3 = vmul.f32 1.442695, %v1990_v4  ;;  %v1492_v6 = vpop.eup %1491  ;;  %1501 = vpow2.f32 %v848_v2  ;;  %v1999_v8 = vsub.f32 %v1910_v39, %v805_v7  ;;  %882 = vadd.xlane.f32.xlu1 %v861_v0  ;;  %884 = vadd.xlane.f32.xlu0 %v862_v18 }
 0x1ee   : > { %v807_v22 = vpop.xlane.xlu1 %806  ;;  %v863_v9 = vsel %vm759_vm0, %v1492_v6, 0.0 }
 0x1ef   : > { %v2002_v31 = vsub.f32 %v1917_v54, %v807_v22  ;;  %1503 = vpow2.f32 %v850_v3  ;;  %v1494_v10 = vpop.eup %1493  ;;  %v852_v13 = vmul.f32 1.442695, %v1999_v8 }
 0x1f0   : > { %v864_v16 = vsel %vm759_vm0, %v1494_v10, 0.0 }
 0x1f1   : > { %v854_v14 = vmul.f32 1.442695, %v2002_v31  ;;  %v1496_v15 = vpop.eup %1495  ;;  %1505 = vpow2.f32 %v852_v13  ;;  %886 = vadd.xlane.f32.xlu1 %v863_v9  ;;  %888 = vadd.xlane.f32.xlu0 %v864_v16  ;;  %v1082_v41 = vpop.xlane.xlu0 %1081 }
 0x1f2   : > { %v865_v39 = vsel %vm759_vm0, %v1496_v15, 0.0  ;;  %v1083_v23 = vrot.slane %v1082_v41, 4  ;;  %v1122_v46 = vpop.xlane.xlu1 %1121 }
 0x1f3   : > { %1507 = vpow2.f32 %v854_v14  ;;  %v1498_v54 = vpop.eup %1497  ;;  %v1123_v29 = vrot.slane %v1122_v46, 4 }
 0x1f4   : > { %v866_v21 = vsel %vm759_vm0, %v1498_v54, 0.0  ;;  %v1084_v48 = vadd.f32 %v1083_v23, %v1082_v41 }
 0x1f5   : > { %v1500_v40 = vpop.eup %1499  ;;  %890 = vadd.xlane.f32.xlu1 %v865_v39  ;;  %892 = vadd.xlane.f32.xlu0 %v866_v21  ;;  %v1124_v34 = vadd.f32 %v1123_v29, %v1122_v46 }
 0x1f6   : > { %v867_v42 = vsel %vm759_vm0, %v1500_v40, 0.0  ;;  %v1085_v35 = vrot.slane %v1084_v48, 2 }
 0x1f7   : > { %v1502_v28 = vpop.eup %1501  ;;  %v1125_v20 = vrot.slane %v1124_v34, 2 }
 0x1f8   : > { %v868_v58 = vsel %vm759_vm0, %v1502_v28, 0.0  ;;  %v1086_v45 = vadd.f32 %v1085_v35, %v1084_v48 }
 0x1f9   : > { %v1504_v33 = vpop.eup %1503  ;;  %894 = vadd.xlane.f32.xlu1 %v867_v42  ;;  %896 = vadd.xlane.f32.xlu0 %v868_v58  ;;  %v1126_v51 = vadd.f32 %v1125_v20, %v1124_v34 }
 0x1fa   : > { %v869_v36 = vsel %vm759_vm0, %v1504_v33, 0.0  ;;  %v1087_v50 = vrot.slane %v1086_v45, 1 }
 0x1fb   : > { %v1506_v37 = vpop.eup %1505  ;;  %v1127_v55 = vrot.slane %v1126_v51, 1 }
 0x1fc   : > { %v870_v49 = vsel %vm759_vm0, %v1506_v37, 0.0  ;;  %v1088_v38 = vadd.f32 %v1087_v50, %v1086_v45 }
 0x1fd   : > { %v1508_v47 = vpop.eup %1507  ;;  %898 = vadd.xlane.f32.xlu1 %v869_v36  ;;  %900 = vadd.xlane.f32.xlu0 %v870_v49  ;;  %v1128_v56 = vadd.f32 %v1127_v55, %v1126_v51 }
 0x1fe   : > { %v871_v52 = vsel %vm759_vm0, %v1508_v47, 0.0  ;;  %1400 = vpush %v1088_v38 }
 0x1ff   : > { %1402 = vpush %v1128_v56 }
 0x201   : > { %902 = vadd.xlane.f32.xlu1 %v871_v52 }
 0x22f   : > { %s1401_s1 = spop %1400 }
 0x230   : > { %v1130_v59 = vstv %s1401_s1  ;;  %s1403_s20 = spop %1402 }
 0x231   : > { %1131 = vst [vmem:[%s1732_s7] sm:$0xff] %v1130_v59  ;;  %v1132_v27 = vstv %s1403_s20 }
 0x232   : > { %1133 = vst [vmem:[%s1737_s28] sm:$0xff] %v1132_v27 }
 0x26e   : > { %v873_v60 = vpop.xlane.xlu0 %872 }
 0x26f   : > { %1509 = vlog2.f32 %v873_v60 }
 0x272   : > { %v875_v61 = vpop.xlane.xlu1 %874  ;;  %v877_v57 = vpop.xlane.xlu0 %876 }
 0x273   : > { %1511 = vlog2.f32 %v875_v61 }
 0x274   : > { %1513 = vlog2.f32 %v877_v57 }
 0x276   : > { %v879_v62 = vpop.xlane.xlu1 %878  ;;  %v881_v0 = vpop.xlane.xlu0 %880 }
 0x277   : > { %1515 = vlog2.f32 %v879_v62 }
 0x278   : > { %1517 = vlog2.f32 %v881_v0 }
 0x279   : > { %v1510_v1 = vpop.eup %1509 }
 0x27a   : > { %v905_v2 = vmul.f32 0.6931472, %v1510_v1  ;;  %v883_v3 = vpop.xlane.xlu1 %882  ;;  %v885_v6 = vpop.xlane.xlu0 %884 }
 0x27b   : > { %1519 = vlog2.f32 %v883_v3 }
 0x27c   : > { %v936_v7 = vsub.f32 %v1929_v11, %v905_v2  ;;  %1521 = vlog2.f32 %v885_v6 }
 0x27d   : > { %v1512_v18 = vpop.eup %1511 }
 0x27e   : > { %v1514_v22 = vpop.eup %1513  ;;  %v952_v9 = vsel %vm759_vm0, %v936_v7, 0.0  ;;  %v907_v10 = vmul.f32 0.6931472, %v1512_v18  ;;  %v887_v13 = vpop.xlane.xlu1 %886 }
 0x27f   : > { %v889_v14 = vpop.xlane.xlu0 %888  ;;  %968 = vst [vmem:[%s1727_s16] sm:$0xff] %v952_v9  ;;  %v909_v15 = vmul.f32 0.6931472, %v1514_v22  ;;  %1523 = vlog2.f32 %v887_v13 }
 0x280   : > { %v937_v16 = vsub.f32 %v1937_v17, %v907_v10  ;;  %1525 = vlog2.f32 %v889_v14 }
 0x281   : > { %v1516_v39 = vpop.eup %1515  ;;  %v938_v11 = vsub.f32 %v1932_v12, %v909_v15 }
 0x282   : > { %v1518_v54 = vpop.eup %1517  ;;  %v953_v40 = vsel %vm759_vm0, %v937_v16, 0.0  ;;  %v911_v21 = vmul.f32 0.6931472, %v1516_v39  ;;  %v891_v41 = vpop.xlane.xlu1 %890 }
 0x283   : > { %v893_v23 = vpop.xlane.xlu0 %892  ;;  %969 = vst [vmem:[%s1727_s16 + $0x8] sm:$0xff] %v953_v40  ;;  %v954_v42 = vsel %vm759_vm0, %v938_v11, 0.0  ;;  %v913_v46 = vmul.f32 0.6931472, %v1518_v54  ;;  %1527 = vlog2.f32 %v891_v41 }
 0x284   : > { %970 = vst [vmem:[%s1727_s16 + $0x10] sm:$0xff] %v954_v42  ;;  %v939_v17 = vsub.f32 %v1940_v19, %v911_v21  ;;  %1529 = vlog2.f32 %v893_v23 }
 0x285   : > { %v1520_v12 = vpop.eup %1519  ;;  %v940_v28 = vsub.f32 %v1945_v24, %v913_v46 }
 0x286   : > { %v1522_v29 = vpop.eup %1521  ;;  %v955_v48 = vsel %vm759_vm0, %v939_v17, 0.0  ;;  %v915_v33 = vmul.f32 0.6931472, %v1520_v12  ;;  %v895_v58 = vpop.xlane.xlu1 %894 }
 0x287   : > { %v897_v34 = vpop.xlane.xlu0 %896  ;;  %971 = vst [vmem:[%s1727_s16 + $0x18] sm:$0xff] %v955_v48  ;;  %v956_v35 = vsel %vm759_vm0, %v940_v28, 0.0  ;;  %v917_v36 = vmul.f32 0.6931472, %v1522_v29  ;;  %1531 = vlog2.f32 %v895_v58 }
 0x288   : > { %972 = vst [vmem:[%s1727_s16 + $0x20] sm:$0xff] %v956_v35  ;;  %v941_v19 = vsub.f32 %v1948_v25, %v915_v33  ;;  %1533 = vlog2.f32 %v897_v34 }
 0x289   : > { %v1524_v24 = vpop.eup %1523  ;;  %v942_v37 = vsub.f32 %v1953_v30, %v917_v36 }
 0x28a   : > { %v1526_v20 = vpop.eup %1525  ;;  %v957_v45 = vsel %vm759_vm0, %v941_v19, 0.0  ;;  %v919_v47 = vmul.f32 0.6931472, %v1524_v24  ;;  %v899_v49 = vpop.xlane.xlu1 %898 }
 0x28b   : > { %v901_v50 = vpop.xlane.xlu0 %900  ;;  %973 = vst [vmem:[%s1727_s16 + $0x28] sm:$0xff] %v957_v45  ;;  %v958_v51 = vsel %vm759_vm0, %v942_v37, 0.0  ;;  %v921_v52 = vmul.f32 0.6931472, %v1526_v20  ;;  %1535 = vlog2.f32 %v899_v49 }
 0x28c   : > { %974 = vst [vmem:[%s1727_s16 + $0x30] sm:$0xff] %v958_v51  ;;  %v943_v25 = vsub.f32 %v1956_v32, %v919_v47  ;;  %1537 = vlog2.f32 %v901_v50 }
 0x28d   : > { %v1528_v30 = vpop.eup %1527  ;;  %v944_v38 = vsub.f32 %v1963_v44, %v921_v52 }
 0x28e   : > { %v1530_v55 = vpop.eup %1529  ;;  %v959_v56 = vsel %vm759_vm0, %v943_v25, 0.0  ;;  %v923_v59 = vmul.f32 0.6931472, %v1528_v30  ;;  %v903_v27 = vpop.xlane.xlu1 %902 }
 0x28f   : > { %975 = vst [vmem:[%s1727_s16 + $0x38] sm:$0xff] %v959_v56  ;;  %v960_v60 = vsel %vm759_vm0, %v944_v38, 0.0  ;;  %v925_v61 = vmul.f32 0.6931472, %v1530_v55  ;;  %1539 = vlog2.f32 %v903_v27 }
 0x290   : > { %976 = vst [vmem:[%s1727_s16 + $0x40] sm:$0xff] %v960_v60  ;;  %v945_v32 = vsub.f32 %v1966_v5, %v923_v59 }
 0x291   : > { %v1532_v57 = vpop.eup %1531  ;;  %v946_v44 = vsub.f32 %v1975_v53, %v925_v61 }
 0x292   : > { %v1534_v62 = vpop.eup %1533  ;;  %v961_v0 = vsel %vm759_vm0, %v945_v32, 0.0  ;;  %v927_v1 = vmul.f32 0.6931472, %v1532_v57 }
 0x293   : > { %977 = vst [vmem:[%s1727_s16 + $0x48] sm:$0xff] %v961_v0  ;;  %v962_v2 = vsel %vm759_vm0, %v946_v44, 0.0  ;;  %v929_v3 = vmul.f32 0.6931472, %v1534_v62 }
 0x294   : > { %978 = vst [vmem:[%s1727_s16 + $0x50] sm:$0xff] %v962_v2  ;;  %v947_v6 = vsub.f32 %v1978_v43, %v927_v1 }
 0x295   : > { %v1536_v5 = vpop.eup %1535  ;;  %v948_v7 = vsub.f32 %v1987_v63, %v929_v3 }
 0x296   : > { %v1538_v53 = vpop.eup %1537  ;;  %v963_v18 = vsel %vm759_vm0, %v947_v6, 0.0  ;;  %v931_v22 = vmul.f32 0.6931472, %v1536_v5 }
 0x297   : > { %979 = vst [vmem:[%s1727_s16 + $0x58] sm:$0xff] %v963_v18  ;;  %v964_v9 = vsel %vm759_vm0, %v948_v7, 0.0  ;;  %v933_v10 = vmul.f32 0.6931472, %v1538_v53 }
 0x298   : > { %980 = vst [vmem:[%s1727_s16 + $0x60] sm:$0xff] %v964_v9  ;;  %v949_v13 = vsub.f32 %v1990_v4, %v931_v22 }
 0x299   : > { %v1540_v14 = vpop.eup %1539  ;;  %v950_v43 = vsub.f32 %v1999_v8, %v933_v10 }
 0x29a   : > { %v965_v63 = vsel %vm759_vm0, %v949_v13, 0.0  ;;  %v935_v15 = vmul.f32 0.6931472, %v1540_v14 }
 0x29b   : > { %981 = vst [vmem:[%s1727_s16 + $0x68] sm:$0xff] %v965_v63  ;;  %v966_v16 = vsel %vm759_vm0, %v950_v43, 0.0 }
 0x29c   : > { %982 = vst [vmem:[%s1727_s16 + $0x70] sm:$0xff] %v966_v16  ;;  %v951_v39 = vsub.f32 %v2002_v31, %v935_v15 }
 0x29e   : > { %v967_v11 = vsel %vm759_vm0, %v951_v39, 0.0 }
 0x29f   : > { %983 = vst [vmem:[%s1727_s16 + $0x78] sm:$0xff] %v967_v11 }
 0x2a0 PF: > { %s16_s24 = sadd.s32 1, %s1595_s24   ;;  %s2122_s18 = smov %s1575_s19 }
 0x2a1   : > { %p13_p1 = scmp.ge.s32.totalorder %s16_s24, 6   ;;  %s2123_s19 = smov %s1679_s6 }
 0x2a2   : > { %s2124_s20 = smov %s1587_s22  ;;  %s2125_s21 = smov %s1591_s23 }
 0x2a3   : > { %s2126_s22 = smov %s2129_s25  ;;  %s2127_s23 = smov %s2133_s26 }
 0x2a4   :  { %15 = sbr.rel (!%p13_p1) target bundleno = 7 (0x7), region = 146 }

</bundles_post_ra>
